<compile_context>
chip_gen: v7x
topology: tpu7x:2x2x1
jax: 0.10.0
libtpu: 0.0.40
codegen_flags: <defaults>
</compile_context>

<pallas_src>
import functools

import jax
import jax.numpy as jnp
import numpy as np
from jax import lax
from jax.experimental import pallas as pl
from jax.experimental.pallas import tpu as pltpu


def _round_up(x, m):
    return (x + m - 1) // m * m


# --------------------------- Fused decoder kernel ----------------------------
def _decoder_fused_kernel(x_ref, w1x_ref, w1h_ref, b1_ref,
                          w2x_ref, w2h_ref, b2_ref, wo_ref, bo_ref,
                          o_ref, xg1_scr, y2_scr, *, batch):
    """Fused Decoder forward: LSTM1 -> LSTM2 -> Linear, single invocation.

    x_ref  : (T*Bp, F)   bf16  time-major flattened input (batch padded)
    w1x_ref: (F, 4F)     bf16  rnn1 W_ih^T, gate order [i,f,o,g]
    w1h_ref: (F, 4F)     bf16  rnn1 W_hh^T, gate order [i,f,o,g]
    b1_ref : (1, 4F)     f32   rnn1 (b_ih + b_hh), gate order [i,f,o,g]
    w2x_ref: (F, 8F)     bf16  rnn2 W_ih^T, gate order [i,f,o,g]
    w2h_ref: (2F, 8F)    bf16  rnn2 W_hh^T, gate order [i,f,o,g]
    b2_ref : (1, 8F)     f32   rnn2 (b_ih + b_hh), gate order [i,f,o,g]
    wo_ref : (2F, Op)    bf16  output W^T, lane-padded
    bo_ref : (1, Op)     f32   output bias, lane-padded
    o_ref  : (T*Bp, Op)  f32   final output (lane-dense store)
    xg1_scr: VMEM (T*Bp, 4F) bf16  hoisted rnn1 input projection
    y2_scr : VMEM (T*Bp, 2F) bf16  rnn2 hidden states for all steps
    """
    B = batch
    TB, F = x_ref.shape
    T = TB // B
    H1 = F
    H2 = 2 * F
    cdt = w1h_ref.dtype  # matmul-operand dtype (bf16)

    def act(g, H):
        # Gate columns are pre-permuted to [i, f, o, g]: one EUP sigmoid over
        # the contiguous 3H slab, one tanh over the last H slab.
        s = jax.nn.sigmoid(g[:, :3 * H])
        return (s[:, 0:H], s[:, H:2 * H], s[:, 2 * H:3 * H],
                jnp.tanh(g[:, 3 * H:4 * H]))

    # --- Hoisted rnn1 input projection: one big matmul, pinned into VMEM
    #     scratch, entirely off the serial recurrence path.
    xg1_scr[...] = (jnp.dot(x_ref[...], w1x_ref[...],
                            preferred_element_type=jnp.float32)
                    + b1_ref[...]).astype(xg1_scr.dtype)

    # Zero-initial recurrent state (PyTorch default), kept in f32 registers.
    h1 = jnp.zeros((B, H1), jnp.float32)
    c1 = jnp.zeros((B, H1), jnp.float32)
    h2 = jnp.zeros((B, H2), jnp.float32)
    c2 = jnp.zeros((B, H2), jnp.float32)

    def step(t, carry):
        h1, c1, h2, c2 = carry
        start = t * B
        if not isinstance(start, int):
            start = pl.multiple_of(start, B)
        rows = pl.ds(start, B)

        # rnn1 step: only the recurrent matmul is on the serial path.
        g1 = (xg1_scr[rows, :].astype(jnp.float32)
              + jnp.dot(h1.astype(cdt), w1h_ref[...],
                        preferred_element_type=jnp.float32))
        i1, f1, o1, gg1 = act(g1, H1)
        c1 = f1 * c1 + i1 * gg1
        h1 = o1 * jnp.tanh(c1)

        # rnn2 step: two register-level MXU pushes, no VMEM pack round trip.
        g2 = (jnp.dot(h1.astype(cdt), w2x_ref[...],
                      preferred_element_type=jnp.float32)
              + jnp.dot(h2.astype(cdt), w2h_ref[...],
                        preferred_element_type=jnp.float32)
              + b2_ref[...])
        i2, f2, o2, gg2 = act(g2, H2)
        c2 = f2 * c2 + i2 * gg2
        h2 = o2 * jnp.tanh(c2)

        # Sublane-aligned (Bp-row) store of this step's rnn2 output.
        y2_scr[rows, :] = h2.astype(y2_scr.dtype)
        return h1, c1, h2, c2

    carry = (h1, c1, h2, c2)
    if T <= 16:
        # Small static T: full unroll keeps every slice static and gives the
        # LLO scheduler the whole recurrence.
        for t in range(T):
            carry = step(t, carry)
    else:
        # Large T: bound live ranges to avoid vreg spills on the serial path.
        carry = lax.fori_loop(0, T, step, carry, unroll=2)

    # --- Hoisted output Linear: one (T*Bp, 2F) @ (2F, Op) matmul and one
    #     lane-dense store.
    o_ref[...] = (jnp.dot(y2_scr[...], wo_ref[...],
                          preferred_element_type=jnp.float32)
                  + bo_ref[...]).astype(o_ref.dtype)


def decoder_forward_pallas(params, x, *, compute_dtype=jnp.bfloat16):
    """x: (B, T, n_features) batch-first, like the PyTorch module."""
    B, T, F = x.shape
    H1, H2 = F, 2 * F
    O = params["out_w"].shape[0]

    SUB, LANE = 8, 128
    Bp = _round_up(B, SUB)      # pad batch to a sublane multiple
    Op = _round_up(O, LANE)     # pad output width to a lane multiple

    # Gate-block permutation: PyTorch [i, f, g, o] -> [i, f, o, g] so the
    # kernel can apply one sigmoid over a contiguous 3H slab + one tanh.
    def perm_w(wT, H):          # wT: (in_dim, 4H)
        return jnp.concatenate(
            [wT[:, 0:2 * H], wT[:, 3 * H:4 * H], wT[:, 2 * H:3 * H]], axis=1)

    def perm_b(b, H):           # b: (4H,)
        return jnp.concatenate(
            [b[0:2 * H], b[3 * H:4 * H], b[2 * H:3 * H]], axis=0)

    w1x = perm_w(params["rnn1_w_ih"].T, H1).astype(compute_dtype)    # (F, 4F)
    w1h = perm_w(params["rnn1_w_hh"].T, H1).astype(compute_dtype)    # (F, 4F)
    b1 = perm_b(params["rnn1_b_ih"] + params["rnn1_b_hh"], H1)[None, :]
    w2x = perm_w(params["rnn2_w_ih"].T, H2).astype(compute_dtype)    # (F, 8F)
    w2h = perm_w(params["rnn2_w_hh"].T, H2).astype(compute_dtype)    # (2F, 8F)
    b2 = perm_b(params["rnn2_b_ih"] + params["rnn2_b_hh"], H2)[None, :]
    wo = jnp.pad(params["out_w"].T, ((0, 0), (0, Op - O))).astype(compute_dtype)
    bo = jnp.pad(params["out_b"], (0, Op - O))[None, :]              # (1, Op)

    # Layout plumbing: time-major, batch padded to Bp, flattened over T*Bp.
    # TODO(synk): for production sizes fold this transpose into a T-chunked
    # grid index_map instead of paying an extra HBM pass here.
    xt = jnp.transpose(x, (1, 0, 2))                                 # (T, B, F)
    xt = jnp.pad(xt, ((0, 0), (0, Bp - B), (0, 0)))
    x2d = xt.reshape(T * Bp, F).astype(compute_dtype)

    operands = (x2d, w1x, w1h, b1, w2x, w2h, b2, wo, bo)

    scratch_shapes = [
        pltpu.VMEM((T * Bp, 4 * H1), compute_dtype),   # xg1 (hoisted proj)
        pltpu.VMEM((T * Bp, H2), compute_dtype),       # y2 for all timesteps
    ]

    # Explicit scoped-VMEM budget (v5e default is only 16 MiB).
    def _nbytes(shape, dtype):
        return int(np.prod(shape)) * jnp.dtype(dtype).itemsize
    need = sum(_nbytes(a.shape, a.dtype) for a in operands)
    need += _nbytes((T * Bp, Op), x.dtype)
    need += _nbytes((T * Bp, 4 * H1), compute_dtype)
    need += _nbytes((T * Bp, H2), compute_dtype)
    vmem_limit = int(min(96 << 20, max(16 << 20, 2 * need + (1 << 20))))

    out2d = pl.pallas_call(
        functools.partial(_decoder_fused_kernel, batch=Bp),
        out_shape=jax.ShapeDtypeStruct((T * Bp, Op), x.dtype),
        in_specs=[pl.BlockSpec(memory_space=pltpu.MemorySpace.VMEM)
                  for _ in range(len(operands))],
        out_specs=pl.BlockSpec(memory_space=pltpu.MemorySpace.VMEM),
        scratch_shapes=scratch_shapes,
        compiler_params=pltpu.CompilerParams(vmem_limit_bytes=vmem_limit),
    )(*operands)

    out = out2d.reshape(T, Bp, Op)[:, :B, :O]                        # unpad
    return jnp.transpose(out, (1, 0, 2))                             # (B, T, O)


# ------------------------------- Parameters -----------------------------------
def init_decoder_params(key, n_features, output_dim):
    """Deterministic synthetic parameters, PyTorch-shaped."""
    hidden_dim = 2 * n_features
    ks = jax.random.split(key, 10)

    def u(k, shape, fan):
        bound = 1.0 / np.sqrt(fan)
        return jax.random.uniform(k, shape, jnp.float32, -bound, bound)

    params = {
        # rnn1: LSTM(n_features -> n_features)
        "rnn1_w_ih": u(ks[0], (4 * n_features, n_features), n_features),
        "rnn1_w_hh": u(ks[1], (4 * n_features, n_features), n_features),
        "rnn1_b_ih": u(ks[2], (4 * n_features,), n_features),
        "rnn1_b_hh": u(ks[3], (4 * n_features,), n_features),
        # rnn2: LSTM(n_features -> hidden_dim)
        "rnn2_w_ih": u(ks[4], (4 * hidden_dim, n_features), hidden_dim),
        "rnn2_w_hh": u(ks[5], (4 * hidden_dim, hidden_dim), hidden_dim),
        "rnn2_b_ih": u(ks[6], (4 * hidden_dim,), hidden_dim),
        "rnn2_b_hh": u(ks[7], (4 * hidden_dim,), hidden_dim),
        # output_layer: Linear(hidden_dim -> output_dim)
        "out_w": u(ks[8], (output_dim, hidden_dim), hidden_dim),
        "out_b": u(ks[9], (output_dim,), hidden_dim),
    }
    return params


# ---------------------------- Pure-JAX reference --------------------------------
def _lstm_ref(x, w_ih, w_hh, b_ih, b_hh):
    """x: (B, T, F) batch-first, PyTorch LSTM semantics, zero init state."""
    B, T, F = x.shape
    H = w_hh.shape[1]

    def step(carry, x_t):
        h, c = carry
        g = x_t @ w_ih.T + b_ih + h @ w_hh.T + b_hh
        i = jax.nn.sigmoid(g[:, 0 * H:1 * H])
        f = jax.nn.sigmoid(g[:, 1 * H:2 * H])
        gg = jnp.tanh(g[:, 2 * H:3 * H])
        o = jax.nn.sigmoid(g[:, 3 * H:4 * H])
        c = f * c + i * gg
        h = o * jnp.tanh(c)
        return (h, c), h

    h0 = jnp.zeros((B, H), jnp.float32)
    c0 = jnp.zeros((B, H), jnp.float32)
    _, ys = lax.scan(step, (h0, c0), jnp.transpose(x, (1, 0, 2)))
    return jnp.transpose(ys, (1, 0, 2))


def decoder_forward_ref(params, x):
    y = _lstm_ref(x, params["rnn1_w_ih"], params["rnn1_w_hh"],
                  params["rnn1_b_ih"], params["rnn1_b_hh"])
    y = _lstm_ref(y, params["rnn2_w_ih"], params["rnn2_w_hh"],
                  params["rnn2_b_ih"], params["rnn2_b_hh"])
    return y @ params["out_w"].T + params["out_b"]


# ------------------------------------ Main --------------------------------------
if __name__ == "__main__":
    B, T = 2, 8
    n_features, output_dim = 4, 4

    key = jax.random.PRNGKey(0)
    k_p, k_x = jax.random.split(key)
    params = init_decoder_params(k_p, n_features, output_dim)
    x = jax.random.normal(k_x, (B, T, n_features), jnp.float32)

    out = decoder_forward_pallas(params, x)
    out = jax.block_until_ready(out)

    ref = decoder_forward_ref(params, x)
    # bf16 matmul operands (f32 accumulation / f32 state & gate math) vs. full
    # f32 reference: loose-but-meaningful tolerance.
    np.testing.assert_allclose(np.asarray(out), np.asarray(ref),
                               rtol=5e-2, atol=5e-2)
    print("KERNEL_OK")
</pallas_src>

<mosaic_0001>
module attributes {stable_mosaic.version = 11 : i64} {
  func.func @_decoder_fused_kernel(%arg0: memref<64x4xbf16, #tpu.memory_space<vmem>>, %arg1: memref<4x16xbf16, #tpu.memory_space<vmem>>, %arg2: memref<4x16xbf16, #tpu.memory_space<vmem>>, %arg3: memref<1x16xf32, #tpu.memory_space<vmem>>, %arg4: memref<4x32xbf16, #tpu.memory_space<vmem>>, %arg5: memref<8x32xbf16, #tpu.memory_space<vmem>>, %arg6: memref<1x32xf32, #tpu.memory_space<vmem>>, %arg7: memref<8x128xbf16, #tpu.memory_space<vmem>>, %arg8: memref<1x128xf32, #tpu.memory_space<vmem>>, %arg9: memref<64x128xf32, #tpu.memory_space<vmem>>, %arg10: memref<64x16xbf16, #tpu.memory_space<vmem>>, %arg11: memref<64x8xbf16, #tpu.memory_space<vmem>>) attributes {dimension_semantics = [], scalar_prefetch = 0 : i64, scratch_operands = 2 : i64, tpu.core_type = #tpu.core_type<tc>} {
    %c0 = arith.constant 0 : index
    %c0_0 = arith.constant 0 : index
    %0 = vector.load %arg0[%c0, %c0_0] : memref<64x4xbf16, #tpu.memory_space<vmem>>, vector<64x4xbf16>
    %c0_1 = arith.constant 0 : index
    %c0_2 = arith.constant 0 : index
    %1 = vector.load %arg1[%c0_1, %c0_2] : memref<4x16xbf16, #tpu.memory_space<vmem>>, vector<4x16xbf16>
    %cst = arith.constant dense<0.000000e+00> : vector<64x16xf32>
    %2 = tpu.matmul %0, %1, %cst {dimension_numbers = #tpu.dot_dimension_numbers<[1], [0], [0], [1], [0, 0, 1, 1], [], []>} : vector<64x4xbf16>, vector<4x16xbf16>, vector<64x16xf32> -> vector<64x16xf32>
    %c0_3 = arith.constant 0 : index
    %c0_4 = arith.constant 0 : index
    %3 = vector.load %arg3[%c0_3, %c0_4] : memref<1x16xf32, #tpu.memory_space<vmem>>, vector<1x16xf32>
    %4 = vector.broadcast %3 : vector<1x16xf32> to vector<64x16xf32>
    %5 = arith.addf %2, %4 : vector<64x16xf32>
    %6 = arith.truncf %5 : vector<64x16xf32> to vector<64x16xbf16>
    %c0_5 = arith.constant 0 : index
    %c0_6 = arith.constant 0 : index
    %7 = vector.load %arg10[%c0_5, %c0_6] : memref<64x16xbf16, #tpu.memory_space<vmem>>, vector<64x16xbf16>
    tpu.vector_store %arg10[%c0_5, %c0_6], %6 {strides = array<i32>} : memref<64x16xbf16, #tpu.memory_space<vmem>>, vector<64x16xbf16>,
    %cst_7 = arith.constant 0.000000e+00 : f32
    %8 = vector.broadcast %cst_7 : f32 to vector<8x4xf32>
    %cst_8 = arith.constant 0.000000e+00 : f32
    %9 = vector.broadcast %cst_8 : f32 to vector<8x4xf32>
    %cst_9 = arith.constant 0.000000e+00 : f32
    %10 = vector.broadcast %cst_9 : f32 to vector<8x8xf32>
    %cst_10 = arith.constant 0.000000e+00 : f32
    %11 = vector.broadcast %cst_10 : f32 to vector<8x8xf32>
    %c0_11 = arith.constant 0 : index
    %c0_12 = arith.constant 0 : index
    %12 = vector.load %arg10[%c0_11, %c0_12] : memref<64x16xbf16, #tpu.memory_space<vmem>>, vector<8x16xbf16>
    %13 = arith.extf %12 : vector<8x16xbf16> to vector<8x16xf32>
    %14 = arith.truncf %8 : vector<8x4xf32> to vector<8x4xbf16>
    %c0_13 = arith.constant 0 : index
    %c0_14 = arith.constant 0 : index
    %15 = vector.load %arg2[%c0_13, %c0_14] : memref<4x16xbf16, #tpu.memory_space<vmem>>, vector<4x16xbf16>
    %cst_15 = arith.constant dense<0.000000e+00> : vector<8x16xf32>
    %16 = tpu.matmul %14, %15, %cst_15 {dimension_numbers = #tpu.dot_dimension_numbers<[1], [0], [0], [1], [0, 0, 1, 1], [], []>} : vector<8x4xbf16>, vector<4x16xbf16>, vector<8x16xf32> -> vector<8x16xf32>
    %17 = arith.addf %13, %16 : vector<8x16xf32>
    %18 = vector.extract_strided_slice %17 {offsets = [0, 0], sizes = [8, 12], strides = [1, 1]} : vector<8x16xf32> to vector<8x12xf32>
    %19 = arith.negf %18 : vector<8x12xf32>
    %20 = math.exp %19 : vector<8x12xf32>
    %cst_16 = arith.constant 1.000000e+00 : f32
    %21 = vector.broadcast %cst_16 : f32 to vector<8x12xf32>
    %22 = arith.addf %21, %20 : vector<8x12xf32>
    %23 = arith.divf %21, %22 : vector<8x12xf32>
    %24 = vector.extract_strided_slice %23 {offsets = [0, 0], sizes = [8, 4], strides = [1, 1]} : vector<8x12xf32> to vector<8x4xf32>
    %25 = vector.extract_strided_slice %23 {offsets = [0, 4], sizes = [8, 4], strides = [1, 1]} : vector<8x12xf32> to vector<8x4xf32>
    %26 = vector.extract_strided_slice %23 {offsets = [0, 8], sizes = [8, 4], strides = [1, 1]} : vector<8x12xf32> to vector<8x4xf32>
    %27 = vector.extract_strided_slice %17 {offsets = [0, 12], sizes = [8, 4], strides = [1, 1]} : vector<8x16xf32> to vector<8x4xf32>
    %28 = math.tanh %27 : vector<8x4xf32>
    %29 = arith.mulf %25, %9 : vector<8x4xf32>
    %30 = arith.mulf %24, %28 : vector<8x4xf32>
    %31 = arith.addf %29, %30 : vector<8x4xf32>
    %32 = math.tanh %31 : vector<8x4xf32>
    %33 = arith.mulf %26, %32 : vector<8x4xf32>
    %34 = arith.truncf %33 : vector<8x4xf32> to vector<8x4xbf16>
    %c0_17 = arith.constant 0 : index
    %c0_18 = arith.constant 0 : index
    %35 = vector.load %arg4[%c0_17, %c0_18] : memref<4x32xbf16, #tpu.memory_space<vmem>>, vector<4x32xbf16>
    %cst_19 = arith.constant dense<0.000000e+00> : vector<8x32xf32>
    %36 = tpu.matmul %34, %35, %cst_19 {dimension_numbers = #tpu.dot_dimension_numbers<[1], [0], [0], [1], [0, 0, 1, 1], [], []>} : vector<8x4xbf16>, vector<4x32xbf16>, vector<8x32xf32> -> vector<8x32xf32>
    %37 = arith.truncf %10 : vector<8x8xf32> to vector<8x8xbf16>
    %c0_20 = arith.constant 0 : index
    %c0_21 = arith.constant 0 : index
    %38 = vector.load %arg5[%c0_20, %c0_21] : memref<8x32xbf16, #tpu.memory_space<vmem>>, vector<8x32xbf16>
    %cst_22 = arith.constant dense<0.000000e+00> : vector<8x32xf32>
    %39 = tpu.matmul %37, %38, %cst_22 {dimension_numbers = #tpu.dot_dimension_numbers<[1], [0], [0], [1], [0, 0, 1, 1], [], []>} : vector<8x8xbf16>, vector<8x32xbf16>, vector<8x32xf32> -> vector<8x32xf32>
    %40 = arith.addf %36, %39 : vector<8x32xf32>
    %c0_23 = arith.constant 0 : index
    %c0_24 = arith.constant 0 : index
    %41 = vector.load %arg6[%c0_23, %c0_24] : memref<1x32xf32, #tpu.memory_space<vmem>>, vector<1x32xf32>
    %42 = vector.broadcast %41 : vector<1x32xf32> to vector<8x32xf32>
    %43 = arith.addf %40, %42 : vector<8x32xf32>
    %44 = vector.extract_strided_slice %43 {offsets = [0, 0], sizes = [8, 24], strides = [1, 1]} : vector<8x32xf32> to vector<8x24xf32>
    %45 = arith.negf %44 : vector<8x24xf32>
    %46 = math.exp %45 : vector<8x24xf32>
    %cst_25 = arith.constant 1.000000e+00 : f32
    %47 = vector.broadcast %cst_25 : f32 to vector<8x24xf32>
    %48 = arith.addf %47, %46 : vector<8x24xf32>
    %49 = arith.divf %47, %48 : vector<8x24xf32>
    %50 = vector.extract_strided_slice %49 {offsets = [0, 0], sizes = [8, 8], strides = [1, 1]} : vector<8x24xf32> to vector<8x8xf32>
    %51 = vector.extract_strided_slice %49 {offsets = [0, 8], sizes = [8, 8], strides = [1, 1]} : vector<8x24xf32> to vector<8x8xf32>
    %52 = vector.extract_strided_slice %49 {offsets = [0, 16], sizes = [8, 8], strides = [1, 1]} : vector<8x24xf32> to vector<8x8xf32>
    %53 = vector.extract_strided_slice %43 {offsets = [0, 24], sizes = [8, 8], strides = [1, 1]} : vector<8x32xf32> to vector<8x8xf32>
    %54 = math.tanh %53 : vector<8x8xf32>
    %55 = arith.mulf %51, %11 : vector<8x8xf32>
    %56 = arith.mulf %50, %54 : vector<8x8xf32>
    %57 = arith.addf %55, %56 : vector<8x8xf32>
    %58 = math.tanh %57 : vector<8x8xf32>
    %59 = arith.mulf %52, %58 : vector<8x8xf32>
    %60 = arith.truncf %59 : vector<8x8xf32> to vector<8x8xbf16>
    %c0_26 = arith.constant 0 : index
    %c0_27 = arith.constant 0 : index
    %61 = vector.load %arg11[%c0_26, %c0_27] : memref<64x8xbf16, #tpu.memory_space<vmem>>, vector<8x8xbf16>
    tpu.vector_store %arg11[%c0_26, %c0_27], %60 {strides = array<i32>} : memref<64x8xbf16, #tpu.memory_space<vmem>>, vector<8x8xbf16>,
    %c8 = arith.constant 8 : index
    %c0_28 = arith.constant 0 : index
    %62 = vector.load %arg10[%c8, %c0_28] : memref<64x16xbf16, #tpu.memory_space<vmem>>, vector<8x16xbf16>
    %63 = arith.extf %62 : vector<8x16xbf16> to vector<8x16xf32>
    %64 = arith.truncf %33 : vector<8x4xf32> to vector<8x4xbf16>
    %c0_29 = arith.constant 0 : index
    %c0_30 = arith.constant 0 : index
    %65 = vector.load %arg2[%c0_29, %c0_30] : memref<4x16xbf16, #tpu.memory_space<vmem>>, vector<4x16xbf16>
    %cst_31 = arith.constant dense<0.000000e+00> : vector<8x16xf32>
    %66 = tpu.matmul %64, %65, %cst_31 {dimension_numbers = #tpu.dot_dimension_numbers<[1], [0], [0], [1], [0, 0, 1, 1], [], []>} : vector<8x4xbf16>, vector<4x16xbf16>, vector<8x16xf32> -> vector<8x16xf32>
    %67 = arith.addf %63, %66 : vector<8x16xf32>
    %68 = vector.extract_strided_slice %67 {offsets = [0, 0], sizes = [8, 12], strides = [1, 1]} : vector<8x16xf32> to vector<8x12xf32>
    %69 = arith.negf %68 : vector<8x12xf32>
    %70 = math.exp %69 : vector<8x12xf32>
    %cst_32 = arith.constant 1.000000e+00 : f32
    %71 = vector.broadcast %cst_32 : f32 to vector<8x12xf32>
    %72 = arith.addf %71, %70 : vector<8x12xf32>
    %73 = arith.divf %71, %72 : vector<8x12xf32>
    %74 = vector.extract_strided_slice %73 {offsets = [0, 0], sizes = [8, 4], strides = [1, 1]} : vector<8x12xf32> to vector<8x4xf32>
    %75 = vector.extract_strided_slice %73 {offsets = [0, 4], sizes = [8, 4], strides = [1, 1]} : vector<8x12xf32> to vector<8x4xf32>
    %76 = vector.extract_strided_slice %73 {offsets = [0, 8], sizes = [8, 4], strides = [1, 1]} : vector<8x12xf32> to vector<8x4xf32>
    %77 = vector.extract_strided_slice %67 {offsets = [0, 12], sizes = [8, 4], strides = [1, 1]} : vector<8x16xf32> to vector<8x4xf32>
    %78 = math.tanh %77 : vector<8x4xf32>
    %79 = arith.mulf %75, %31 : vector<8x4xf32>
    %80 = arith.mulf %74, %78 : vector<8x4xf32>
    %81 = arith.addf %79, %80 : vector<8x4xf32>
    %82 = math.tanh %81 : vector<8x4xf32>
    %83 = arith.mulf %76, %82 : vector<8x4xf32>
    %84 = arith.truncf %83 : vector<8x4xf32> to vector<8x4xbf16>
    %c0_33 = arith.constant 0 : index
    %c0_34 = arith.constant 0 : index
    %85 = vector.load %arg4[%c0_33, %c0_34] : memref<4x32xbf16, #tpu.memory_space<vmem>>, vector<4x32xbf16>
    %cst_35 = arith.constant dense<0.000000e+00> : vector<8x32xf32>
    %86 = tpu.matmul %84, %85, %cst_35 {dimension_numbers = #tpu.dot_dimension_numbers<[1], [0], [0], [1], [0, 0, 1, 1], [], []>} : vector<8x4xbf16>, vector<4x32xbf16>, vector<8x32xf32> -> vector<8x32xf32>
    %87 = arith.truncf %59 : vector<8x8xf32> to vector<8x8xbf16>
    %c0_36 = arith.constant 0 : index
    %c0_37 = arith.constant 0 : index
    %88 = vector.load %arg5[%c0_36, %c0_37] : memref<8x32xbf16, #tpu.memory_space<vmem>>, vector<8x32xbf16>
    %cst_38 = arith.constant dense<0.000000e+00> : vector<8x32xf32>
    %89 = tpu.matmul %87, %88, %cst_38 {dimension_numbers = #tpu.dot_dimension_numbers<[1], [0], [0], [1], [0, 0, 1, 1], [], []>} : vector<8x8xbf16>, vector<8x32xbf16>, vector<8x32xf32> -> vector<8x32xf32>
    %90 = arith.addf %86, %89 : vector<8x32xf32>
    %c0_39 = arith.constant 0 : index
    %c0_40 = arith.constant 0 : index
    %91 = vector.load %arg6[%c0_39, %c0_40] : memref<1x32xf32, #tpu.memory_space<vmem>>, vector<1x32xf32>
    %92 = vector.broadcast %91 : vector<1x32xf32> to vector<8x32xf32>
    %93 = arith.addf %90, %92 : vector<8x32xf32>
    %94 = vector.extract_strided_slice %93 {offsets = [0, 0], sizes = [8, 24], strides = [1, 1]} : vector<8x32xf32> to vector<8x24xf32>
    %95 = arith.negf %94 : vector<8x24xf32>
    %96 = math.exp %95 : vector<8x24xf32>
    %cst_41 = arith.constant 1.000000e+00 : f32
    %97 = vector.broadcast %cst_41 : f32 to vector<8x24xf32>
    %98 = arith.addf %97, %96 : vector<8x24xf32>
    %99 = arith.divf %97, %98 : vector<8x24xf32>
    %100 = vector.extract_strided_slice %99 {offsets = [0, 0], sizes = [8, 8], strides = [1, 1]} : vector<8x24xf32> to vector<8x8xf32>
    %101 = vector.extract_strided_slice %99 {offsets = [0, 8], sizes = [8, 8], strides = [1, 1]} : vector<8x24xf32> to vector<8x8xf32>
    %102 = vector.extract_strided_slice %99 {offsets = [0, 16], sizes = [8, 8], strides = [1, 1]} : vector<8x24xf32> to vector<8x8xf32>
    %103 = vector.extract_strided_slice %93 {offsets = [0, 24], sizes = [8, 8], strides = [1, 1]} : vector<8x32xf32> to vector<8x8xf32>
    %104 = math.tanh %103 : vector<8x8xf32>
    %105 = arith.mulf %101, %57 : vector<8x8xf32>
    %106 = arith.mulf %100, %104 : vector<8x8xf32>
    %107 = arith.addf %105, %106 : vector<8x8xf32>
    %108 = math.tanh %107 : vector<8x8xf32>
    %109 = arith.mulf %102, %108 : vector<8x8xf32>
    %110 = arith.truncf %109 : vector<8x8xf32> to vector<8x8xbf16>
    %c8_42 = arith.constant 8 : index
    %c0_43 = arith.constant 0 : index
    %111 = vector.load %arg11[%c8_42, %c0_43] : memref<64x8xbf16, #tpu.memory_space<vmem>>, vector<8x8xbf16>
    tpu.vector_store %arg11[%c8_42, %c0_43], %110 {strides = array<i32>} : memref<64x8xbf16, #tpu.memory_space<vmem>>, vector<8x8xbf16>,
    %c16 = arith.constant 16 : index
    %c0_44 = arith.constant 0 : index
    %112 = vector.load %arg10[%c16, %c0_44] : memref<64x16xbf16, #tpu.memory_space<vmem>>, vector<8x16xbf16>
    %113 = arith.extf %112 : vector<8x16xbf16> to vector<8x16xf32>
    %114 = arith.truncf %83 : vector<8x4xf32> to vector<8x4xbf16>
    %c0_45 = arith.constant 0 : index
    %c0_46 = arith.constant 0 : index
    %115 = vector.load %arg2[%c0_45, %c0_46] : memref<4x16xbf16, #tpu.memory_space<vmem>>, vector<4x16xbf16>
    %cst_47 = arith.constant dense<0.000000e+00> : vector<8x16xf32>
    %116 = tpu.matmul %114, %115, %cst_47 {dimension_numbers = #tpu.dot_dimension_numbers<[1], [0], [0], [1], [0, 0, 1, 1], [], []>} : vector<8x4xbf16>, vector<4x16xbf16>, vector<8x16xf32> -> vector<8x16xf32>
    %117 = arith.addf %113, %116 : vector<8x16xf32>
    %118 = vector.extract_strided_slice %117 {offsets = [0, 0], sizes = [8, 12], strides = [1, 1]} : vector<8x16xf32> to vector<8x12xf32>
    %119 = arith.negf %118 : vector<8x12xf32>
    %120 = math.exp %119 : vector<8x12xf32>
    %cst_48 = arith.constant 1.000000e+00 : f32
    %121 = vector.broadcast %cst_48 : f32 to vector<8x12xf32>
    %122 = arith.addf %121, %120 : vector<8x12xf32>
    %123 = arith.divf %121, %122 : vector<8x12xf32>
    %124 = vector.extract_strided_slice %123 {offsets = [0, 0], sizes = [8, 4], strides = [1, 1]} : vector<8x12xf32> to vector<8x4xf32>
    %125 = vector.extract_strided_slice %123 {offsets = [0, 4], sizes = [8, 4], strides = [1, 1]} : vector<8x12xf32> to vector<8x4xf32>
    %126 = vector.extract_strided_slice %123 {offsets = [0, 8], sizes = [8, 4], strides = [1, 1]} : vector<8x12xf32> to vector<8x4xf32>
    %127 = vector.extract_strided_slice %117 {offsets = [0, 12], sizes = [8, 4], strides = [1, 1]} : vector<8x16xf32> to vector<8x4xf32>
    %128 = math.tanh %127 : vector<8x4xf32>
    %129 = arith.mulf %125, %81 : vector<8x4xf32>
    %130 = arith.mulf %124, %128 : vector<8x4xf32>
    %131 = arith.addf %129, %130 : vector<8x4xf32>
    %132 = math.tanh %131 : vector<8x4xf32>
    %133 = arith.mulf %126, %132 : vector<8x4xf32>
    %134 = arith.truncf %133 : vector<8x4xf32> to vector<8x4xbf16>
    %c0_49 = arith.constant 0 : index
    %c0_50 = arith.constant 0 : index
    %135 = vector.load %arg4[%c0_49, %c0_50] : memref<4x32xbf16, #tpu.memory_space<vmem>>, vector<4x32xbf16>
    %cst_51 = arith.constant dense<0.000000e+00> : vector<8x32xf32>
    %136 = tpu.matmul %134, %135, %cst_51 {dimension_numbers = #tpu.dot_dimension_numbers<[1], [0], [0], [1], [0, 0, 1, 1], [], []>} : vector<8x4xbf16>, vector<4x32xbf16>, vector<8x32xf32> -> vector<8x32xf32>
    %137 = arith.truncf %109 : vector<8x8xf32> to vector<8x8xbf16>
    %c0_52 = arith.constant 0 : index
    %c0_53 = arith.constant 0 : index
    %138 = vector.load %arg5[%c0_52, %c0_53] : memref<8x32xbf16, #tpu.memory_space<vmem>>, vector<8x32xbf16>
    %cst_54 = arith.constant dense<0.000000e+00> : vector<8x32xf32>
    %139 = tpu.matmul %137, %138, %cst_54 {dimension_numbers = #tpu.dot_dimension_numbers<[1], [0], [0], [1], [0, 0, 1, 1], [], []>} : vector<8x8xbf16>, vector<8x32xbf16>, vector<8x32xf32> -> vector<8x32xf32>
    %140 = arith.addf %136, %139 : vector<8x32xf32>
    %c0_55 = arith.constant 0 : index
    %c0_56 = arith.constant 0 : index
    %141 = vector.load %arg6[%c0_55, %c0_56] : memref<1x32xf32, #tpu.memory_space<vmem>>, vector<1x32xf32>
    %142 = vector.broadcast %141 : vector<1x32xf32> to vector<8x32xf32>
    %143 = arith.addf %140, %142 : vector<8x32xf32>
    %144 = vector.extract_strided_slice %143 {offsets = [0, 0], sizes = [8, 24], strides = [1, 1]} : vector<8x32xf32> to vector<8x24xf32>
    %145 = arith.negf %144 : vector<8x24xf32>
    %146 = math.exp %145 : vector<8x24xf32>
    %cst_57 = arith.constant 1.000000e+00 : f32
    %147 = vector.broadcast %cst_57 : f32 to vector<8x24xf32>
    %148 = arith.addf %147, %146 : vector<8x24xf32>
    %149 = arith.divf %147, %148 : vector<8x24xf32>
    %150 = vector.extract_strided_slice %149 {offsets = [0, 0], sizes = [8, 8], strides = [1, 1]} : vector<8x24xf32> to vector<8x8xf32>
    %151 = vector.extract_strided_slice %149 {offsets = [0, 8], sizes = [8, 8], strides = [1, 1]} : vector<8x24xf32> to vector<8x8xf32>
    %152 = vector.extract_strided_slice %149 {offsets = [0, 16], sizes = [8, 8], strides = [1, 1]} : vector<8x24xf32> to vector<8x8xf32>
    %153 = vector.extract_strided_slice %143 {offsets = [0, 24], sizes = [8, 8], strides = [1, 1]} : vector<8x32xf32> to vector<8x8xf32>
    %154 = math.tanh %153 : vector<8x8xf32>
    %155 = arith.mulf %151, %107 : vector<8x8xf32>
    %156 = arith.mulf %150, %154 : vector<8x8xf32>
    %157 = arith.addf %155, %156 : vector<8x8xf32>
    %158 = math.tanh %157 : vector<8x8xf32>
    %159 = arith.mulf %152, %158 : vector<8x8xf32>
    %160 = arith.truncf %159 : vector<8x8xf32> to vector<8x8xbf16>
    %c16_58 = arith.constant 16 : index
    %c0_59 = arith.constant 0 : index
    %161 = vector.load %arg11[%c16_58, %c0_59] : memref<64x8xbf16, #tpu.memory_space<vmem>>, vector<8x8xbf16>
    tpu.vector_store %arg11[%c16_58, %c0_59], %160 {strides = array<i32>} : memref<64x8xbf16, #tpu.memory_space<vmem>>, vector<8x8xbf16>,
    %c24 = arith.constant 24 : index
    %c0_60 = arith.constant 0 : index
    %162 = vector.load %arg10[%c24, %c0_60] : memref<64x16xbf16, #tpu.memory_space<vmem>>, vector<8x16xbf16>
    %163 = arith.extf %162 : vector<8x16xbf16> to vector<8x16xf32>
    %164 = arith.truncf %133 : vector<8x4xf32> to vector<8x4xbf16>
    %c0_61 = arith.constant 0 : index
    %c0_62 = arith.constant 0 : index
    %165 = vector.load %arg2[%c0_61, %c0_62] : memref<4x16xbf16, #tpu.memory_space<vmem>>, vector<4x16xbf16>
    %cst_63 = arith.constant dense<0.000000e+00> : vector<8x16xf32>
    %166 = tpu.matmul %164, %165, %cst_63 {dimension_numbers = #tpu.dot_dimension_numbers<[1], [0], [0], [1], [0, 0, 1, 1], [], []>} : vector<8x4xbf16>, vector<4x16xbf16>, vector<8x16xf32> -> vector<8x16xf32>
    %167 = arith.addf %163, %166 : vector<8x16xf32>
    %168 = vector.extract_strided_slice %167 {offsets = [0, 0], sizes = [8, 12], strides = [1, 1]} : vector<8x16xf32> to vector<8x12xf32>
    %169 = arith.negf %168 : vector<8x12xf32>
    %170 = math.exp %169 : vector<8x12xf32>
    %cst_64 = arith.constant 1.000000e+00 : f32
    %171 = vector.broadcast %cst_64 : f32 to vector<8x12xf32>
    %172 = arith.addf %171, %170 : vector<8x12xf32>
    %173 = arith.divf %171, %172 : vector<8x12xf32>
    %174 = vector.extract_strided_slice %173 {offsets = [0, 0], sizes = [8, 4], strides = [1, 1]} : vector<8x12xf32> to vector<8x4xf32>
    %175 = vector.extract_strided_slice %173 {offsets = [0, 4], sizes = [8, 4], strides = [1, 1]} : vector<8x12xf32> to vector<8x4xf32>
    %176 = vector.extract_strided_slice %173 {offsets = [0, 8], sizes = [8, 4], strides = [1, 1]} : vector<8x12xf32> to vector<8x4xf32>
    %177 = vector.extract_strided_slice %167 {offsets = [0, 12], sizes = [8, 4], strides = [1, 1]} : vector<8x16xf32> to vector<8x4xf32>
    %178 = math.tanh %177 : vector<8x4xf32>
    %179 = arith.mulf %175, %131 : vector<8x4xf32>
    %180 = arith.mulf %174, %178 : vector<8x4xf32>
    %181 = arith.addf %179, %180 : vector<8x4xf32>
    %182 = math.tanh %181 : vector<8x4xf32>
    %183 = arith.mulf %176, %182 : vector<8x4xf32>
    %184 = arith.truncf %183 : vector<8x4xf32> to vector<8x4xbf16>
    %c0_65 = arith.constant 0 : index
    %c0_66 = arith.constant 0 : index
    %185 = vector.load %arg4[%c0_65, %c0_66] : memref<4x32xbf16, #tpu.memory_space<vmem>>, vector<4x32xbf16>
    %cst_67 = arith.constant dense<0.000000e+00> : vector<8x32xf32>
    %186 = tpu.matmul %184, %185, %cst_67 {dimension_numbers = #tpu.dot_dimension_numbers<[1], [0], [0], [1], [0, 0, 1, 1], [], []>} : vector<8x4xbf16>, vector<4x32xbf16>, vector<8x32xf32> -> vector<8x32xf32>
    %187 = arith.truncf %159 : vector<8x8xf32> to vector<8x8xbf16>
    %c0_68 = arith.constant 0 : index
    %c0_69 = arith.constant 0 : index
    %188 = vector.load %arg5[%c0_68, %c0_69] : memref<8x32xbf16, #tpu.memory_space<vmem>>, vector<8x32xbf16>
    %cst_70 = arith.constant dense<0.000000e+00> : vector<8x32xf32>
    %189 = tpu.matmul %187, %188, %cst_70 {dimension_numbers = #tpu.dot_dimension_numbers<[1], [0], [0], [1], [0, 0, 1, 1], [], []>} : vector<8x8xbf16>, vector<8x32xbf16>, vector<8x32xf32> -> vector<8x32xf32>
    %190 = arith.addf %186, %189 : vector<8x32xf32>
    %c0_71 = arith.constant 0 : index
    %c0_72 = arith.constant 0 : index
    %191 = vector.load %arg6[%c0_71, %c0_72] : memref<1x32xf32, #tpu.memory_space<vmem>>, vector<1x32xf32>
    %192 = vector.broadcast %191 : vector<1x32xf32> to vector<8x32xf32>
    %193 = arith.addf %190, %192 : vector<8x32xf32>
    %194 = vector.extract_strided_slice %193 {offsets = [0, 0], sizes = [8, 24], strides = [1, 1]} : vector<8x32xf32> to vector<8x24xf32>
    %195 = arith.negf %194 : vector<8x24xf32>
    %196 = math.exp %195 : vector<8x24xf32>
    %cst_73 = arith.constant 1.000000e+00 : f32
    %197 = vector.broadcast %cst_73 : f32 to vector<8x24xf32>
    %198 = arith.addf %197, %196 : vector<8x24xf32>
    %199 = arith.divf %197, %198 : vector<8x24xf32>
    %200 = vector.extract_strided_slice %199 {offsets = [0, 0], sizes = [8, 8], strides = [1, 1]} : vector<8x24xf32> to vector<8x8xf32>
    %201 = vector.extract_strided_slice %199 {offsets = [0, 8], sizes = [8, 8], strides = [1, 1]} : vector<8x24xf32> to vector<8x8xf32>
    %202 = vector.extract_strided_slice %199 {offsets = [0, 16], sizes = [8, 8], strides = [1, 1]} : vector<8x24xf32> to vector<8x8xf32>
    %203 = vector.extract_strided_slice %193 {offsets = [0, 24], sizes = [8, 8], strides = [1, 1]} : vector<8x32xf32> to vector<8x8xf32>
    %204 = math.tanh %203 : vector<8x8xf32>
    %205 = arith.mulf %201, %157 : vector<8x8xf32>
    %206 = arith.mulf %200, %204 : vector<8x8xf32>
    %207 = arith.addf %205, %206 : vector<8x8xf32>
    %208 = math.tanh %207 : vector<8x8xf32>
    %209 = arith.mulf %202, %208 : vector<8x8xf32>
    %210 = arith.truncf %209 : vector<8x8xf32> to vector<8x8xbf16>
    %c24_74 = arith.constant 24 : index
    %c0_75 = arith.constant 0 : index
    %211 = vector.load %arg11[%c24_74, %c0_75] : memref<64x8xbf16, #tpu.memory_space<vmem>>, vector<8x8xbf16>
    tpu.vector_store %arg11[%c24_74, %c0_75], %210 {strides = array<i32>} : memref<64x8xbf16, #tpu.memory_space<vmem>>, vector<8x8xbf16>,
    %c32 = arith.constant 32 : index
    %c0_76 = arith.constant 0 : index
    %212 = vector.load %arg10[%c32, %c0_76] : memref<64x16xbf16, #tpu.memory_space<vmem>>, vector<8x16xbf16>
    %213 = arith.extf %212 : vector<8x16xbf16> to vector<8x16xf32>
    %214 = arith.truncf %183 : vector<8x4xf32> to vector<8x4xbf16>
    %c0_77 = arith.constant 0 : index
    %c0_78 = arith.constant 0 : index
    %215 = vector.load %arg2[%c0_77, %c0_78] : memref<4x16xbf16, #tpu.memory_space<vmem>>, vector<4x16xbf16>
    %cst_79 = arith.constant dense<0.000000e+00> : vector<8x16xf32>
    %216 = tpu.matmul %214, %215, %cst_79 {dimension_numbers = #tpu.dot_dimension_numbers<[1], [0], [0], [1], [0, 0, 1, 1], [], []>} : vector<8x4xbf16>, vector<4x16xbf16>, vector<8x16xf32> -> vector<8x16xf32>
    %217 = arith.addf %213, %216 : vector<8x16xf32>
    %218 = vector.extract_strided_slice %217 {offsets = [0, 0], sizes = [8, 12], strides = [1, 1]} : vector<8x16xf32> to vector<8x12xf32>
    %219 = arith.negf %218 : vector<8x12xf32>
    %220 = math.exp %219 : vector<8x12xf32>
    %cst_80 = arith.constant 1.000000e+00 : f32
    %221 = vector.broadcast %cst_80 : f32 to vector<8x12xf32>
    %222 = arith.addf %221, %220 : vector<8x12xf32>
    %223 = arith.divf %221, %222 : vector<8x12xf32>
    %224 = vector.extract_strided_slice %223 {offsets = [0, 0], sizes = [8, 4], strides = [1, 1]} : vector<8x12xf32> to vector<8x4xf32>
    %225 = vector.extract_strided_slice %223 {offsets = [0, 4], sizes = [8, 4], strides = [1, 1]} : vector<8x12xf32> to vector<8x4xf32>
    %226 = vector.extract_strided_slice %223 {offsets = [0, 8], sizes = [8, 4], strides = [1, 1]} : vector<8x12xf32> to vector<8x4xf32>
    %227 = vector.extract_strided_slice %217 {offsets = [0, 12], sizes = [8, 4], strides = [1, 1]} : vector<8x16xf32> to vector<8x4xf32>
    %228 = math.tanh %227 : vector<8x4xf32>
    %229 = arith.mulf %225, %181 : vector<8x4xf32>
    %230 = arith.mulf %224, %228 : vector<8x4xf32>
    %231 = arith.addf %229, %230 : vector<8x4xf32>
    %232 = math.tanh %231 : vector<8x4xf32>
    %233 = arith.mulf %226, %232 : vector<8x4xf32>
    %234 = arith.truncf %233 : vector<8x4xf32> to vector<8x4xbf16>
    %c0_81 = arith.constant 0 : index
    %c0_82 = arith.constant 0 : index
    %235 = vector.load %arg4[%c0_81, %c0_82] : memref<4x32xbf16, #tpu.memory_space<vmem>>, vector<4x32xbf16>
    %cst_83 = arith.constant dense<0.000000e+00> : vector<8x32xf32>
    %236 = tpu.matmul %234, %235, %cst_83 {dimension_numbers = #tpu.dot_dimension_numbers<[1], [0], [0], [1], [0, 0, 1, 1], [], []>} : vector<8x4xbf16>, vector<4x32xbf16>, vector<8x32xf32> -> vector<8x32xf32>
    %237 = arith.truncf %209 : vector<8x8xf32> to vector<8x8xbf16>
    %c0_84 = arith.constant 0 : index
    %c0_85 = arith.constant 0 : index
    %238 = vector.load %arg5[%c0_84, %c0_85] : memref<8x32xbf16, #tpu.memory_space<vmem>>, vector<8x32xbf16>
    %cst_86 = arith.constant dense<0.000000e+00> : vector<8x32xf32>
    %239 = tpu.matmul %237, %238, %cst_86 {dimension_numbers = #tpu.dot_dimension_numbers<[1], [0], [0], [1], [0, 0, 1, 1], [], []>} : vector<8x8xbf16>, vector<8x32xbf16>, vector<8x32xf32> -> vector<8x32xf32>
    %240 = arith.addf %236, %239 : vector<8x32xf32>
    %c0_87 = arith.constant 0 : index
    %c0_88 = arith.constant 0 : index
    %241 = vector.load %arg6[%c0_87, %c0_88] : memref<1x32xf32, #tpu.memory_space<vmem>>, vector<1x32xf32>
    %242 = vector.broadcast %241 : vector<1x32xf32> to vector<8x32xf32>
    %243 = arith.addf %240, %242 : vector<8x32xf32>
    %244 = vector.extract_strided_slice %243 {offsets = [0, 0], sizes = [8, 24], strides = [1, 1]} : vector<8x32xf32> to vector<8x24xf32>
    %245 = arith.negf %244 : vector<8x24xf32>
    %246 = math.exp %245 : vector<8x24xf32>
    %cst_89 = arith.constant 1.000000e+00 : f32
    %247 = vector.broadcast %cst_89 : f32 to vector<8x24xf32>
    %248 = arith.addf %247, %246 : vector<8x24xf32>
    %249 = arith.divf %247, %248 : vector<8x24xf32>
    %250 = vector.extract_strided_slice %249 {offsets = [0, 0], sizes = [8, 8], strides = [1, 1]} : vector<8x24xf32> to vector<8x8xf32>
    %251 = vector.extract_strided_slice %249 {offsets = [0, 8], sizes = [8, 8], strides = [1, 1]} : vector<8x24xf32> to vector<8x8xf32>
    %252 = vector.extract_strided_slice %249 {offsets = [0, 16], sizes = [8, 8], strides = [1, 1]} : vector<8x24xf32> to vector<8x8xf32>
    %253 = vector.extract_strided_slice %243 {offsets = [0, 24], sizes = [8, 8], strides = [1, 1]} : vector<8x32xf32> to vector<8x8xf32>
    %254 = math.tanh %253 : vector<8x8xf32>
    %255 = arith.mulf %251, %207 : vector<8x8xf32>
    %256 = arith.mulf %250, %254 : vector<8x8xf32>
    %257 = arith.addf %255, %256 : vector<8x8xf32>
    %258 = math.tanh %257 : vector<8x8xf32>
    %259 = arith.mulf %252, %258 : vector<8x8xf32>
    %260 = arith.truncf %259 : vector<8x8xf32> to vector<8x8xbf16>
    %c32_90 = arith.constant 32 : index
    %c0_91 = arith.constant 0 : index
    %261 = vector.load %arg11[%c32_90, %c0_91] : memref<64x8xbf16, #tpu.memory_space<vmem>>, vector<8x8xbf16>
    tpu.vector_store %arg11[%c32_90, %c0_91], %260 {strides = array<i32>} : memref<64x8xbf16, #tpu.memory_space<vmem>>, vector<8x8xbf16>,
    %c40 = arith.constant 40 : index
    %c0_92 = arith.constant 0 : index
    %262 = vector.load %arg10[%c40, %c0_92] : memref<64x16xbf16, #tpu.memory_space<vmem>>, vector<8x16xbf16>
    %263 = arith.extf %262 : vector<8x16xbf16> to vector<8x16xf32>
    %264 = arith.truncf %233 : vector<8x4xf32> to vector<8x4xbf16>
    %c0_93 = arith.constant 0 : index
    %c0_94 = arith.constant 0 : index
    %265 = vector.load %arg2[%c0_93, %c0_94] : memref<4x16xbf16, #tpu.memory_space<vmem>>, vector<4x16xbf16>
    %cst_95 = arith.constant dense<0.000000e+00> : vector<8x16xf32>
    %266 = tpu.matmul %264, %265, %cst_95 {dimension_numbers = #tpu.dot_dimension_numbers<[1], [0], [0], [1], [0, 0, 1, 1], [], []>} : vector<8x4xbf16>, vector<4x16xbf16>, vector<8x16xf32> -> vector<8x16xf32>
    %267 = arith.addf %263, %266 : vector<8x16xf32>
    %268 = vector.extract_strided_slice %267 {offsets = [0, 0], sizes = [8, 12], strides = [1, 1]} : vector<8x16xf32> to vector<8x12xf32>
    %269 = arith.negf %268 : vector<8x12xf32>
    %270 = math.exp %269 : vector<8x12xf32>
    %cst_96 = arith.constant 1.000000e+00 : f32
    %271 = vector.broadcast %cst_96 : f32 to vector<8x12xf32>
    %272 = arith.addf %271, %270 : vector<8x12xf32>
    %273 = arith.divf %271, %272 : vector<8x12xf32>
    %274 = vector.extract_strided_slice %273 {offsets = [0, 0], sizes = [8, 4], strides = [1, 1]} : vector<8x12xf32> to vector<8x4xf32>
    %275 = vector.extract_strided_slice %273 {offsets = [0, 4], sizes = [8, 4], strides = [1, 1]} : vector<8x12xf32> to vector<8x4xf32>
    %276 = vector.extract_strided_slice %273 {offsets = [0, 8], sizes = [8, 4], strides = [1, 1]} : vector<8x12xf32> to vector<8x4xf32>
    %277 = vector.extract_strided_slice %267 {offsets = [0, 12], sizes = [8, 4], strides = [1, 1]} : vector<8x16xf32> to vector<8x4xf32>
    %278 = math.tanh %277 : vector<8x4xf32>
    %279 = arith.mulf %275, %231 : vector<8x4xf32>
    %280 = arith.mulf %274, %278 : vector<8x4xf32>
    %281 = arith.addf %279, %280 : vector<8x4xf32>
    %282 = math.tanh %281 : vector<8x4xf32>
    %283 = arith.mulf %276, %282 : vector<8x4xf32>
    %284 = arith.truncf %283 : vector<8x4xf32> to vector<8x4xbf16>
    %c0_97 = arith.constant 0 : index
    %c0_98 = arith.constant 0 : index
    %285 = vector.load %arg4[%c0_97, %c0_98] : memref<4x32xbf16, #tpu.memory_space<vmem>>, vector<4x32xbf16>
    %cst_99 = arith.constant dense<0.000000e+00> : vector<8x32xf32>
    %286 = tpu.matmul %284, %285, %cst_99 {dimension_numbers = #tpu.dot_dimension_numbers<[1], [0], [0], [1], [0, 0, 1, 1], [], []>} : vector<8x4xbf16>, vector<4x32xbf16>, vector<8x32xf32> -> vector<8x32xf32>
    %287 = arith.truncf %259 : vector<8x8xf32> to vector<8x8xbf16>
    %c0_100 = arith.constant 0 : index
    %c0_101 = arith.constant 0 : index
    %288 = vector.load %arg5[%c0_100, %c0_101] : memref<8x32xbf16, #tpu.memory_space<vmem>>, vector<8x32xbf16>
    %cst_102 = arith.constant dense<0.000000e+00> : vector<8x32xf32>
    %289 = tpu.matmul %287, %288, %cst_102 {dimension_numbers = #tpu.dot_dimension_numbers<[1], [0], [0], [1], [0, 0, 1, 1], [], []>} : vector<8x8xbf16>, vector<8x32xbf16>, vector<8x32xf32> -> vector<8x32xf32>
    %290 = arith.addf %286, %289 : vector<8x32xf32>
    %c0_103 = arith.constant 0 : index
    %c0_104 = arith.constant 0 : index
    %291 = vector.load %arg6[%c0_103, %c0_104] : memref<1x32xf32, #tpu.memory_space<vmem>>, vector<1x32xf32>
    %292 = vector.broadcast %291 : vector<1x32xf32> to vector<8x32xf32>
    %293 = arith.addf %290, %292 : vector<8x32xf32>
    %294 = vector.extract_strided_slice %293 {offsets = [0, 0], sizes = [8, 24], strides = [1, 1]} : vector<8x32xf32> to vector<8x24xf32>
    %295 = arith.negf %294 : vector<8x24xf32>
    %296 = math.exp %295 : vector<8x24xf32>
    %cst_105 = arith.constant 1.000000e+00 : f32
    %297 = vector.broadcast %cst_105 : f32 to vector<8x24xf32>
    %298 = arith.addf %297, %296 : vector<8x24xf32>
    %299 = arith.divf %297, %298 : vector<8x24xf32>
    %300 = vector.extract_strided_slice %299 {offsets = [0, 0], sizes = [8, 8], strides = [1, 1]} : vector<8x24xf32> to vector<8x8xf32>
    %301 = vector.extract_strided_slice %299 {offsets = [0, 8], sizes = [8, 8], strides = [1, 1]} : vector<8x24xf32> to vector<8x8xf32>
    %302 = vector.extract_strided_slice %299 {offsets = [0, 16], sizes = [8, 8], strides = [1, 1]} : vector<8x24xf32> to vector<8x8xf32>
    %303 = vector.extract_strided_slice %293 {offsets = [0, 24], sizes = [8, 8], strides = [1, 1]} : vector<8x32xf32> to vector<8x8xf32>
    %304 = math.tanh %303 : vector<8x8xf32>
    %305 = arith.mulf %301, %257 : vector<8x8xf32>
    %306 = arith.mulf %300, %304 : vector<8x8xf32>
    %307 = arith.addf %305, %306 : vector<8x8xf32>
    %308 = math.tanh %307 : vector<8x8xf32>
    %309 = arith.mulf %302, %308 : vector<8x8xf32>
    %310 = arith.truncf %309 : vector<8x8xf32> to vector<8x8xbf16>
    %c40_106 = arith.constant 40 : index
    %c0_107 = arith.constant 0 : index
    %311 = vector.load %arg11[%c40_106, %c0_107] : memref<64x8xbf16, #tpu.memory_space<vmem>>, vector<8x8xbf16>
    tpu.vector_store %arg11[%c40_106, %c0_107], %310 {strides = array<i32>} : memref<64x8xbf16, #tpu.memory_space<vmem>>, vector<8x8xbf16>,
    %c48 = arith.constant 48 : index
    %c0_108 = arith.constant 0 : index
    %312 = vector.load %arg10[%c48, %c0_108] : memref<64x16xbf16, #tpu.memory_space<vmem>>, vector<8x16xbf16>
    %313 = arith.extf %312 : vector<8x16xbf16> to vector<8x16xf32>
    %314 = arith.truncf %283 : vector<8x4xf32> to vector<8x4xbf16>
    %c0_109 = arith.constant 0 : index
    %c0_110 = arith.constant 0 : index
    %315 = vector.load %arg2[%c0_109, %c0_110] : memref<4x16xbf16, #tpu.memory_space<vmem>>, vector<4x16xbf16>
    %cst_111 = arith.constant dense<0.000000e+00> : vector<8x16xf32>
    %316 = tpu.matmul %314, %315, %cst_111 {dimension_numbers = #tpu.dot_dimension_numbers<[1], [0], [0], [1], [0, 0, 1, 1], [], []>} : vector<8x4xbf16>, vector<4x16xbf16>, vector<8x16xf32> -> vector<8x16xf32>
    %317 = arith.addf %313, %316 : vector<8x16xf32>
    %318 = vector.extract_strided_slice %317 {offsets = [0, 0], sizes = [8, 12], strides = [1, 1]} : vector<8x16xf32> to vector<8x12xf32>
    %319 = arith.negf %318 : vector<8x12xf32>
    %320 = math.exp %319 : vector<8x12xf32>
    %cst_112 = arith.constant 1.000000e+00 : f32
    %321 = vector.broadcast %cst_112 : f32 to vector<8x12xf32>
    %322 = arith.addf %321, %320 : vector<8x12xf32>
    %323 = arith.divf %321, %322 : vector<8x12xf32>
    %324 = vector.extract_strided_slice %323 {offsets = [0, 0], sizes = [8, 4], strides = [1, 1]} : vector<8x12xf32> to vector<8x4xf32>
    %325 = vector.extract_strided_slice %323 {offsets = [0, 4], sizes = [8, 4], strides = [1, 1]} : vector<8x12xf32> to vector<8x4xf32>
    %326 = vector.extract_strided_slice %323 {offsets = [0, 8], sizes = [8, 4], strides = [1, 1]} : vector<8x12xf32> to vector<8x4xf32>
    %327 = vector.extract_strided_slice %317 {offsets = [0, 12], sizes = [8, 4], strides = [1, 1]} : vector<8x16xf32> to vector<8x4xf32>
    %328 = math.tanh %327 : vector<8x4xf32>
    %329 = arith.mulf %325, %281 : vector<8x4xf32>
    %330 = arith.mulf %324, %328 : vector<8x4xf32>
    %331 = arith.addf %329, %330 : vector<8x4xf32>
    %332 = math.tanh %331 : vector<8x4xf32>
    %333 = arith.mulf %326, %332 : vector<8x4xf32>
    %334 = arith.truncf %333 : vector<8x4xf32> to vector<8x4xbf16>
    %c0_113 = arith.constant 0 : index
    %c0_114 = arith.constant 0 : index
    %335 = vector.load %arg4[%c0_113, %c0_114] : memref<4x32xbf16, #tpu.memory_space<vmem>>, vector<4x32xbf16>
    %cst_115 = arith.constant dense<0.000000e+00> : vector<8x32xf32>
    %336 = tpu.matmul %334, %335, %cst_115 {dimension_numbers = #tpu.dot_dimension_numbers<[1], [0], [0], [1], [0, 0, 1, 1], [], []>} : vector<8x4xbf16>, vector<4x32xbf16>, vector<8x32xf32> -> vector<8x32xf32>
    %337 = arith.truncf %309 : vector<8x8xf32> to vector<8x8xbf16>
    %c0_116 = arith.constant 0 : index
    %c0_117 = arith.constant 0 : index
    %338 = vector.load %arg5[%c0_116, %c0_117] : memref<8x32xbf16, #tpu.memory_space<vmem>>, vector<8x32xbf16>
    %cst_118 = arith.constant dense<0.000000e+00> : vector<8x32xf32>
    %339 = tpu.matmul %337, %338, %cst_118 {dimension_numbers = #tpu.dot_dimension_numbers<[1], [0], [0], [1], [0, 0, 1, 1], [], []>} : vector<8x8xbf16>, vector<8x32xbf16>, vector<8x32xf32> -> vector<8x32xf32>
    %340 = arith.addf %336, %339 : vector<8x32xf32>
    %c0_119 = arith.constant 0 : index
    %c0_120 = arith.constant 0 : index
    %341 = vector.load %arg6[%c0_119, %c0_120] : memref<1x32xf32, #tpu.memory_space<vmem>>, vector<1x32xf32>
    %342 = vector.broadcast %341 : vector<1x32xf32> to vector<8x32xf32>
    %343 = arith.addf %340, %342 : vector<8x32xf32>
    %344 = vector.extract_strided_slice %343 {offsets = [0, 0], sizes = [8, 24], strides = [1, 1]} : vector<8x32xf32> to vector<8x24xf32>
    %345 = arith.negf %344 : vector<8x24xf32>
    %346 = math.exp %345 : vector<8x24xf32>
    %cst_121 = arith.constant 1.000000e+00 : f32
    %347 = vector.broadcast %cst_121 : f32 to vector<8x24xf32>
    %348 = arith.addf %347, %346 : vector<8x24xf32>
    %349 = arith.divf %347, %348 : vector<8x24xf32>
    %350 = vector.extract_strided_slice %349 {offsets = [0, 0], sizes = [8, 8], strides = [1, 1]} : vector<8x24xf32> to vector<8x8xf32>
    %351 = vector.extract_strided_slice %349 {offsets = [0, 8], sizes = [8, 8], strides = [1, 1]} : vector<8x24xf32> to vector<8x8xf32>
    %352 = vector.extract_strided_slice %349 {offsets = [0, 16], sizes = [8, 8], strides = [1, 1]} : vector<8x24xf32> to vector<8x8xf32>
    %353 = vector.extract_strided_slice %343 {offsets = [0, 24], sizes = [8, 8], strides = [1, 1]} : vector<8x32xf32> to vector<8x8xf32>
    %354 = math.tanh %353 : vector<8x8xf32>
    %355 = arith.mulf %351, %307 : vector<8x8xf32>
    %356 = arith.mulf %350, %354 : vector<8x8xf32>
    %357 = arith.addf %355, %356 : vector<8x8xf32>
    %358 = math.tanh %357 : vector<8x8xf32>
    %359 = arith.mulf %352, %358 : vector<8x8xf32>
    %360 = arith.truncf %359 : vector<8x8xf32> to vector<8x8xbf16>
    %c48_122 = arith.constant 48 : index
    %c0_123 = arith.constant 0 : index
    %361 = vector.load %arg11[%c48_122, %c0_123] : memref<64x8xbf16, #tpu.memory_space<vmem>>, vector<8x8xbf16>
    tpu.vector_store %arg11[%c48_122, %c0_123], %360 {strides = array<i32>} : memref<64x8xbf16, #tpu.memory_space<vmem>>, vector<8x8xbf16>,
    %c56 = arith.constant 56 : index
    %c0_124 = arith.constant 0 : index
    %362 = vector.load %arg10[%c56, %c0_124] : memref<64x16xbf16, #tpu.memory_space<vmem>>, vector<8x16xbf16>
    %363 = arith.extf %362 : vector<8x16xbf16> to vector<8x16xf32>
    %364 = arith.truncf %333 : vector<8x4xf32> to vector<8x4xbf16>
    %c0_125 = arith.constant 0 : index
    %c0_126 = arith.constant 0 : index
    %365 = vector.load %arg2[%c0_125, %c0_126] : memref<4x16xbf16, #tpu.memory_space<vmem>>, vector<4x16xbf16>
    %cst_127 = arith.constant dense<0.000000e+00> : vector<8x16xf32>
    %366 = tpu.matmul %364, %365, %cst_127 {dimension_numbers = #tpu.dot_dimension_numbers<[1], [0], [0], [1], [0, 0, 1, 1], [], []>} : vector<8x4xbf16>, vector<4x16xbf16>, vector<8x16xf32> -> vector<8x16xf32>
    %367 = arith.addf %363, %366 : vector<8x16xf32>
    %368 = vector.extract_strided_slice %367 {offsets = [0, 0], sizes = [8, 12], strides = [1, 1]} : vector<8x16xf32> to vector<8x12xf32>
    %369 = arith.negf %368 : vector<8x12xf32>
    %370 = math.exp %369 : vector<8x12xf32>
    %cst_128 = arith.constant 1.000000e+00 : f32
    %371 = vector.broadcast %cst_128 : f32 to vector<8x12xf32>
    %372 = arith.addf %371, %370 : vector<8x12xf32>
    %373 = arith.divf %371, %372 : vector<8x12xf32>
    %374 = vector.extract_strided_slice %373 {offsets = [0, 0], sizes = [8, 4], strides = [1, 1]} : vector<8x12xf32> to vector<8x4xf32>
    %375 = vector.extract_strided_slice %373 {offsets = [0, 4], sizes = [8, 4], strides = [1, 1]} : vector<8x12xf32> to vector<8x4xf32>
    %376 = vector.extract_strided_slice %373 {offsets = [0, 8], sizes = [8, 4], strides = [1, 1]} : vector<8x12xf32> to vector<8x4xf32>
    %377 = vector.extract_strided_slice %367 {offsets = [0, 12], sizes = [8, 4], strides = [1, 1]} : vector<8x16xf32> to vector<8x4xf32>
    %378 = math.tanh %377 : vector<8x4xf32>
    %379 = arith.mulf %375, %331 : vector<8x4xf32>
    %380 = arith.mulf %374, %378 : vector<8x4xf32>
    %381 = arith.addf %379, %380 : vector<8x4xf32>
    %382 = math.tanh %381 : vector<8x4xf32>
    %383 = arith.mulf %376, %382 : vector<8x4xf32>
    %384 = arith.truncf %383 : vector<8x4xf32> to vector<8x4xbf16>
    %c0_129 = arith.constant 0 : index
    %c0_130 = arith.constant 0 : index
    %385 = vector.load %arg4[%c0_129, %c0_130] : memref<4x32xbf16, #tpu.memory_space<vmem>>, vector<4x32xbf16>
    %cst_131 = arith.constant dense<0.000000e+00> : vector<8x32xf32>
    %386 = tpu.matmul %384, %385, %cst_131 {dimension_numbers = #tpu.dot_dimension_numbers<[1], [0], [0], [1], [0, 0, 1, 1], [], []>} : vector<8x4xbf16>, vector<4x32xbf16>, vector<8x32xf32> -> vector<8x32xf32>
    %387 = arith.truncf %359 : vector<8x8xf32> to vector<8x8xbf16>
    %c0_132 = arith.constant 0 : index
    %c0_133 = arith.constant 0 : index
    %388 = vector.load %arg5[%c0_132, %c0_133] : memref<8x32xbf16, #tpu.memory_space<vmem>>, vector<8x32xbf16>
    %cst_134 = arith.constant dense<0.000000e+00> : vector<8x32xf32>
    %389 = tpu.matmul %387, %388, %cst_134 {dimension_numbers = #tpu.dot_dimension_numbers<[1], [0], [0], [1], [0, 0, 1, 1], [], []>} : vector<8x8xbf16>, vector<8x32xbf16>, vector<8x32xf32> -> vector<8x32xf32>
    %390 = arith.addf %386, %389 : vector<8x32xf32>
    %c0_135 = arith.constant 0 : index
    %c0_136 = arith.constant 0 : index
    %391 = vector.load %arg6[%c0_135, %c0_136] : memref<1x32xf32, #tpu.memory_space<vmem>>, vector<1x32xf32>
    %392 = vector.broadcast %391 : vector<1x32xf32> to vector<8x32xf32>
    %393 = arith.addf %390, %392 : vector<8x32xf32>
    %394 = vector.extract_strided_slice %393 {offsets = [0, 0], sizes = [8, 24], strides = [1, 1]} : vector<8x32xf32> to vector<8x24xf32>
    %395 = arith.negf %394 : vector<8x24xf32>
    %396 = math.exp %395 : vector<8x24xf32>
    %cst_137 = arith.constant 1.000000e+00 : f32
    %397 = vector.broadcast %cst_137 : f32 to vector<8x24xf32>
    %398 = arith.addf %397, %396 : vector<8x24xf32>
    %399 = arith.divf %397, %398 : vector<8x24xf32>
    %400 = vector.extract_strided_slice %399 {offsets = [0, 0], sizes = [8, 8], strides = [1, 1]} : vector<8x24xf32> to vector<8x8xf32>
    %401 = vector.extract_strided_slice %399 {offsets = [0, 8], sizes = [8, 8], strides = [1, 1]} : vector<8x24xf32> to vector<8x8xf32>
    %402 = vector.extract_strided_slice %399 {offsets = [0, 16], sizes = [8, 8], strides = [1, 1]} : vector<8x24xf32> to vector<8x8xf32>
    %403 = vector.extract_strided_slice %393 {offsets = [0, 24], sizes = [8, 8], strides = [1, 1]} : vector<8x32xf32> to vector<8x8xf32>
    %404 = math.tanh %403 : vector<8x8xf32>
    %405 = arith.mulf %401, %357 : vector<8x8xf32>
    %406 = arith.mulf %400, %404 : vector<8x8xf32>
    %407 = arith.addf %405, %406 : vector<8x8xf32>
    %408 = math.tanh %407 : vector<8x8xf32>
    %409 = arith.mulf %402, %408 : vector<8x8xf32>
    %410 = arith.truncf %409 : vector<8x8xf32> to vector<8x8xbf16>
    %c56_138 = arith.constant 56 : index
    %c0_139 = arith.constant 0 : index
    %411 = vector.load %arg11[%c56_138, %c0_139] : memref<64x8xbf16, #tpu.memory_space<vmem>>, vector<8x8xbf16>
    tpu.vector_store %arg11[%c56_138, %c0_139], %410 {strides = array<i32>} : memref<64x8xbf16, #tpu.memory_space<vmem>>, vector<8x8xbf16>,
    %c0_140 = arith.constant 0 : index
    %c0_141 = arith.constant 0 : index
    %412 = vector.load %arg11[%c0_140, %c0_141] : memref<64x8xbf16, #tpu.memory_space<vmem>>, vector<64x8xbf16>
    %c0_142 = arith.constant 0 : index
    %c0_143 = arith.constant 0 : index
    %413 = vector.load %arg7[%c0_142, %c0_143] : memref<8x128xbf16, #tpu.memory_space<vmem>>, vector<8x128xbf16>
    %cst_144 = arith.constant dense<0.000000e+00> : vector<64x128xf32>
    %414 = tpu.matmul %412, %413, %cst_144 {dimension_numbers = #tpu.dot_dimension_numbers<[1], [0], [0], [1], [0, 0, 1, 1], [], []>} : vector<64x8xbf16>, vector<8x128xbf16>, vector<64x128xf32> -> vector<64x128xf32>
    %c0_145 = arith.constant 0 : index
    %c0_146 = arith.constant 0 : index
    %415 = vector.load %arg8[%c0_145, %c0_146] : memref<1x128xf32, #tpu.memory_space<vmem>>, vector<1x128xf32>
    %416 = vector.broadcast %415 : vector<1x128xf32> to vector<64x128xf32>
    %417 = arith.addf %414, %416 : vector<64x128xf32>
    %c0_147 = arith.constant 0 : index
    %c0_148 = arith.constant 0 : index
    %418 = vector.load %arg9[%c0_147, %c0_148] : memref<64x128xf32, #tpu.memory_space<vmem>>, vector<64x128xf32>
    tpu.vector_store %arg9[%c0_147, %c0_148], %417 {strides = array<i32>} : memref<64x128xf32, #tpu.memory_space<vmem>>, vector<64x128xf32>,
    return
  }
}

</mosaic_0001>

<bundles_post_ra>
// kernel: tpu_custom_call.1
= control target key start
LH: loop header
LB: loop body
LE: loop exit
PB: predicated region body
PF: predicated region fallthrough
CT: control target
= control target key end

     0   :  { %vm83_vm0 = vcmask 1041408   ;;  %vm70_vm1 = vcmask 31744   ;;  %v2415_v5 = vmov 0.0   ;;  %s2880_s0 = inlined_call_operand.vmem [shape: bf16[64,4], index: 0, kind: input, shape index: {}]   ;;  %s2881_s1 = inlined_call_operand.vmem [shape: bf16[4,16], index: 1, kind: input, shape index: {}]   ;;  %s2882_s2 = inlined_call_operand.vmem [shape: bf16[4,16], index: 2, kind: input, shape index: {}]   ;;  %s2883_s3 = inlined_call_operand.vmem [shape: f32[1,16], index: 3, kind: input, shape index: {}]   ;;  %s2884_s4 = inlined_call_operand.vmem [shape: bf16[4,32], index: 4, kind: input, shape index: {}]   ;;  %s2885_s5 = inlined_call_operand.vmem [shape: bf16[8,32], index: 5, kind: input, shape index: {}]   ;;  %s2886_s6 = inlined_call_operand.vmem [shape: f32[1,32], index: 6, kind: input, shape index: {}]   ;;  %s2887_s7 = inlined_call_operand.vmem [shape: bf16[8,128], index: 7, kind: input, shape index: {}]   ;;  %s2888_s8 = inlined_call_operand.vmem [shape: f32[1,128], index: 8, kind: input, shape index: {}]   ;;  %s2889_s9 = inlined_call_operand.hbm [shape: f32[64,128], index: 9, kind: output, shape index: {}]  }
   0x1   :  { %v42_v0 = vld [vmem:[%s2881_s1] sm:$0x3]  ;;  %v2260_v3 = vld [vmem:[%s2880_s0 + $0x8] sm:$0xff]   ;;  %v2261_v4 = vld [vmem:[%s2880_s0 + $0x10] sm:$0xff]  }
   0x2   :  { %v2259_v1 = vld [vmem:[%s2880_s0] sm:$0xff]   ;;  %2245 = vmatprep.subr.msk.bf16.mxu0 %vm83_vm0, %v42_v0  ;;  %v85_v2 = vsel %vm83_vm0, %v42_v0, 0  ;;  %2246 = vmatprep.subr.msk.bf16.mxu1 %vm83_vm0, %v42_v0  ;;  %v2262_v6 = vld [vmem:[%s2880_s0 + $0x18] sm:$0xff]  }
   0x3   :  { %2080 = vmatpush3.bf16.msra.mxu0 %v85_v2  ;;  %2081 = vmatprep.mubr.msk.bf16.mxu0 %vm70_vm1, %v2259_v1  ;;  %v163_v7 = vld [vmem:[%s2882_s2] sm:$0x3] }
   0x4   :  { %2244 = vmatpush3.bf16.msra.mxu1 %v85_v2  ;;  %2101 = vmatprep.subr.bf16.mxu0 %v2415_v5  ;;  %v168_v8 = vsel %vm83_vm0, %v163_v7, 0 }
   0x5   :  { %2089 = vmatprep.subr.bf16.mxu1 %v2415_v5  ;;  %2085 = vmatprep.mubr.msk.bf16.mxu1 %vm70_vm1, %v2261_v4 }
   0x6   :  { %2082 = vmatmul.mubr.msk.bf16.vlgmr.msra.gmra.mrb[0].mxu0 %vm70_vm1, %v2260_v3 }
   0x7   :  { %14 = vsyncpa [#allocation5], 0  ;;  %2086 = vmatmul.mubr.msk.bf16.vlgmr.msra.gmra.mrb[0].mxu1 %vm70_vm1, %v2262_v6  ;;  %vm2416_vm2 = vmmov 0   ;;  %v2417_v9 = vmov 0   ;;  %v1961_v11 = vld [vmem:[%s2883_s3] ss:$0 sm:$0xff] }
   0x8   :  { %2103 = vmatprep.mubr.msk.bf16.mxu0 %vm2416_vm2, %v2415_v5  ;;  %2090 = vmatpush3.bf16.msra.mxu1 %v168_v8  ;;  %vm156_vm3 = vcmask 130048   ;;  %s2418_s3 = smov 116   ;;  %s2419_s21 = smov 4   ;;  %v237_v48 = vld [vmem:[%s2885_s5] sm:$0xf]  ;;  %vm241_vm4 = vcmask 1043456  }
   0x9   :  { %2091 = vmatprep.mubr.msk.bf16.mxu1 %vm2416_vm2, %v2415_v5  ;;  %2095 = vmatprep.subr.bf16.mxu1 %v2415_v5  ;;  %v236_v49 = vld [vmem:[%s2884_s4] sm:$0x3]  ;;  %v243_v50 = vsel %vm241_vm4, %v237_v48, 0  ;;  %s2420_s28 = smov 120   ;;  %s2421_s10 = smov 104   ;;  %vm371_vm5 = vcmask 60416  }
   0xa   :  { %v292_v51 = vsel %vm83_vm0, %v236_v49, 0  ;;  %v378_v52 = vld [vmem:[%s2882_s2] sm:$0x3]  ;;  %s2422_s11 = smov 8   ;;  %s2423_s15 = smov 112   ;;  %vm238_vm6 = vcmask 64512  }
   0xb   :  { %2102 = vmatpush3.bf16.msra.mxu0 %v292_v51  ;;  %v380_v53 = vsel %vm83_vm0, %v378_v52, 0  ;;  %v2552_v3 = vld [vmem:[%s2886_s6] ss:$0 sm:$0xff]  ;;  %vm583_vm7 = vcmask 64516  }
   0xc   :  { %2113 = vmatprep.subr.bf16.mxu0 %v2415_v5  ;;  %v587_v48 = vld [vmem:[%s2882_s2] sm:$0x3] }
   0xf   :  { %2092 = vmatmul.mubr.bf16.vlgmr.msra.gmra.mrb[4].mxu1 %v2417_v9 }
  0x10   :  { %2097 = vmatprep.mubr.msk.bf16.mxu1 %vm2416_vm2, %v2415_v5  ;;  %2096 = vmatpush3.bf16.msra.mxu1 %v243_v50  ;;  %v589_v50 = vsel %vm83_vm0, %v587_v48, 0 }
  0x11   :  { %2107 = vmatprep.subr.bf16.mxu1 %v2415_v5 }
  0x17   :  { %2098 = vmatmul.mubr.bf16.vlgmr.msra.gmra.mrb[8].mxu1 %v2417_v9 }
  0x18   :  { %2108 = vmatpush3.bf16.msra.mxu1 %v380_v53  ;;  %2109 = vmatprep.mubr.msk.bf16.mxu1 %vm2416_vm2, %v2415_v5 }
  0x19   :  { %2119 = vmatprep.subr.bf16.mxu1 %v2415_v5 }
  0xd9   :  { %v2083_v10 = vpop.f32.mrb[0].mxu0 }
  0xda   :  { %v121_v12 = vpop.f32.mrb[1].mxu0  ;;  %v2087_v13 = vpop.f32.mrb[0].mxu1  ;;  %v130_v17 = vadd.f32 %v2083_v10, %v1961_v11 }
  0xdb   :  { %v2084_v14 = vpop.f32.mrb[2].mxu0  ;;  %v146_v15 = vadd.f32 %v2087_v13, %v1961_v11  ;;  %v137_v16 = vpop.f32.mrb[1].mxu1  ;;  %v122_v22 = vadd.f32 %v1961_v11, %v121_v12 }
  0xdc   :  { %v133_v18 = vadd.f32 %v2084_v14, %v1961_v11  ;;  %v124_v19 = vpop.f32.mrb[3].mxu0  ;;  %v138_v20 = vadd.f32 %v1961_v11, %v137_v16  ;;  %v2088_v21 = vpop.f32.mrb[2].mxu1 }
  0xdd   :  { %v125_v23 = vadd.f32 %v1961_v11, %v124_v19  ;;  %v149_v24 = vadd.f32 %v2088_v21, %v1961_v11  ;;  %v140_v25 = vpop.f32.mrb[3].mxu1 }
  0xde   :  { %v153_v26 = vpack.c.bf16 %v133_v18, %v130_v17  ;;  %v141_v27 = vadd.f32 %v1961_v11, %v140_v25 }
  0xdf   :  { %v152_v28 = vpack.c.bf16 %v125_v23, %v122_v22  ;;  %v155_v29 = vpack.c.bf16 %v149_v24, %v146_v15 }
  0xe0   :  { %158 = vst.msk [vmem:[#allocation2 + $0x8] sm:$0xff] %vm156_vm3, %v153_v26  ;;  %v154_v30 = vpack.c.bf16 %v141_v27, %v138_v20 }
  0xe1   :  { %157 = vst.msk [vmem:[#allocation2] sm:$0xff] %vm156_vm3, %v152_v28  ;;  %160 = vst.msk [vmem:[#allocation2 + $0x18] sm:$0xff] %vm156_vm3, %v155_v29 }
  0xe2   :  { %159 = vst.msk [vmem:[#allocation2 + $0x10] sm:$0xff] %vm156_vm3, %v154_v30  ;;  %v204_v31 = vpop.f32.mrb[4].mxu1 }
  0xe3   :  { %v2093_v32 = vpop.f32.mrb[5].mxu1 }
  0xe4   :  { %v207_v33 = vpop.f32.mrb[6].mxu1 }
  0xe5   :  { %v2094_v34 = vpop.f32.mrb[7].mxu1 }
  0xe8   :  { %v2515_v35 = vld [vmem:[#allocation2] ss:$8 sps:$4 sm:$0xff]   ;;  %v373_v63 = vld [vmem:[#allocation2] sm:$0xf0] }
  0xe9   :  { %v162_v36 = vunpack.c.l.bf16 %v2515_v35  ;;  %v375_v0 = vrot.slane %v373_v63, 4 }
  0xea   :  { %v279_v58 = vpop.f32.mrb[8].mxu1 }
  0xeb   :  { %v210_v37 = vadd.f32 %v204_v31, %v162_v36  ;;  %v2099_v59 = vpop.f32.mrb[9].mxu1  ;;  %v377_v1 = vunpack.c.l.bf16 %v375_v0  ;;  %v449_v36 = vld [vmem:[%s2885_s5] sm:$0xf] }
  0xec   :  { %v282_v60 = vpop.f32.mrb[10].mxu1 }
  0xed   :  { %2263 = vtanh.f32 %v210_v37  ;;  %v1970_v39 = vmul.f32 -1.442695, %v210_v37  ;;  %v2100_v61 = vpop.f32.mrb[11].mxu1  ;;  %v448_v37 = vld [vmem:[%s2884_s4] sm:$0x3] }
  0xef   :  { %2265 = vpow2.f32 %v1970_v39  ;;  %v503_v39 = vsel %vm83_vm0, %v448_v37, 0 }
  0xf7   :  { %v2264_v38 = vpop.eup %2263 }
  0xf8   :  { %220 = vrot.lane.b32.xlu0 %v2264_v38, %s2418_s3  ;;  %v454_v38 = vsel %vm241_vm4, %v449_v36, 0 }
  0xf9   :  { %v2266_v40 = vpop.eup %2265 }
  0xfa   :  { %v214_v41 = vadd.f32 1.0, %v2266_v40 }
  0xfc   :  { %2267 = vrcp.f32 %v214_v41 }
 0x106   :  { %v2268_v42 = vpop.eup %2267 }
 0x107   :  { %v218_v45 = vmul.f32 0.0, %v2268_v42 }
 0x16a   :  { %v221_v43 = vpop.permute.xlu0 %220 }
 0x16b   :  { %v223_v44 = vmul.f32 %v2268_v42, %v221_v43 }
 0x16d   :  { %225 = vrot.lane.b32.xlu0 %v223_v44, %s2419_s21 }
 0x1df   :  { %v226_v46 = vpop.permute.xlu0 %225 }
 0x1e0   :  { %v2520_v47 = vadd.f32 %v226_v46, %v218_v45 }
 0x1e2   :  { %2269 = vtanh.f32 %v2520_v47 }
 0x1ec   :  { %v2270_v54 = vpop.eup %2269 }
 0x1ed   :  { %231 = vrot.lane.b32.xlu1 %v2270_v54, %s2419_s21 }
 0x25f   :  { %v232_v55 = vpop.permute.xlu1 %231 }
 0x260   :  { %v234_v56 = vmul.f32 %v2268_v42, %v232_v55 }
 0x262   :  { %v235_v57 = vpack.c.bf16 %v234_v56, %v234_v56 }
 0x264   :  { %286 = vrot.lane.b32.xlu1 %v235_v57, %s2420_s28 }
 0x2d6   :  { %v287_v62 = vpop.permute.xlu1 %286 }
 0x2d7   :  { %2104 = vmatmul.mubr.msk.bf16.vlgmr.msra.gmra.mrb[4].mxu0 %vm70_vm1, %v287_v62  ;;  %2110 = vmatmul.mubr.msk.bf16.vlgmr.msra.gmra.mrb[12].mxu1 %vm70_vm1, %v287_v62  ;;  %v586_v62 = vunpack.c.h.bf16 %v2515_v35 }
 0x2d8   :  { %2121 = vmatprep.mubr.msk.bf16.mxu1 %vm2416_vm2, %v2415_v5  ;;  %2115 = vmatprep.mubr.msk.bf16.mxu0 %vm2416_vm2, %v2415_v5 }
 0x2d9   :  { %2114 = vmatpush3.bf16.msra.mxu0 %v454_v38  ;;  %2120 = vmatpush3.bf16.msra.mxu1 %v503_v39  ;;  %v799_v38 = vld [vmem:[%s2882_s2] sm:$0x3] }
 0x2da   :  { %2125 = vmatprep.subr.bf16.mxu0 %v2415_v5  ;;  %2131 = vmatprep.subr.bf16.mxu1 %v2415_v5  ;;  %v801_v39 = vsel %vm83_vm0, %v799_v38, 0 }
 0x3aa   :  { %v328_v2 = vpop.f32.mrb[4].mxu0  ;;  %v416_v4 = vpop.f32.mrb[12].mxu1 }
 0x3ab   :  { %v329_v6 = vadd.f32 %v328_v2, %v279_v58  ;;  %v422_v7 = vadd.f32 %v416_v4, %v377_v1  ;;  %v2105_v8 = vpop.f32.mrb[5].mxu0  ;;  %v2111_v9 = vpop.f32.mrb[13].mxu1 }
 0x3ac   :  { %v331_v10 = vpop.f32.mrb[6].mxu0  ;;  %v419_v11 = vpop.f32.mrb[14].mxu1 }
 0x3ad   :  { %v341_v12 = vadd.f32 %v2552_v3, %v329_v6  ;;  %2271 = vtanh.f32 %v422_v7  ;;  %v2106_v13 = vpop.f32.mrb[7].mxu0  ;;  %v2112_v14 = vpop.f32.mrb[15].mxu1  ;;  %v1975_v17 = vmul.f32 -1.442695, %v422_v7 }
 0x3af   :  { %2273 = vtanh.f32 %v341_v12  ;;  %v1973_v18 = vmul.f32 -1.442695, %v341_v12 }
 0x3b0   :  { %2275 = vpow2.f32 %v1975_v17 }
 0x3b1   :  { %2277 = vpow2.f32 %v1973_v18 }
 0x3b7   :  { %v2272_v15 = vpop.eup %2271 }
 0x3b8   :  { %432 = vrot.lane.b32.xlu1 %v2272_v15, %s2418_s3 }
 0x3b9   :  { %v2274_v16 = vpop.eup %2273 }
 0x3ba   :  { %351 = vrot.lane.b32.xlu0 %v2274_v16, %s2421_s10  ;;  %v2276_v19 = vpop.eup %2275 }
 0x3bb   :  { %v2278_v20 = vpop.eup %2277  ;;  %v426_v21 = vadd.f32 1.0, %v2276_v19 }
 0x3bc   :  { %v345_v22 = vadd.f32 1.0, %v2278_v20 }
 0x3bd   :  { %2279 = vrcp.f32 %v426_v21 }
 0x3be   :  { %2281 = vrcp.f32 %v345_v22 }
 0x3c7   :  { %v2280_v23 = vpop.eup %2279 }
 0x3c8   :  { %v2282_v26 = vpop.eup %2281  ;;  %v430_v29 = vmul.f32 %v2280_v23, %v2520_v47 }
 0x3c9   :  { %v349_v32 = vmul.f32 0.0, %v2282_v26 }
 0x42a   :  { %v433_v24 = vpop.permute.xlu1 %432 }
 0x42b   :  { %v435_v25 = vmul.f32 %v2280_v23, %v433_v24 }
 0x42c   :  { %v352_v27 = vpop.permute.xlu0 %351 }
 0x42d   :  { %v354_v28 = vmul.f32 %v2282_v26, %v352_v27  ;;  %437 = vrot.lane.b32.xlu1 %v435_v25, %s2419_s21  ;;  %v658_v25 = vld [vmem:[%s2885_s5] sm:$0xf] }
 0x42e   :  { %v665_v27 = vsel %vm241_vm4, %v658_v25, 0 }
 0x42f   :  { %356 = vrot.lane.b32.xlu0 %v354_v28, %s2422_s11 }
 0x49f   :  { %v438_v30 = vpop.permute.xlu1 %437 }
 0x4a0   :  { %v2560_v31 = vadd.f32 %v438_v30, %v430_v29 }
 0x4a1   :  { %v357_v33 = vpop.permute.xlu0 %356 }
 0x4a2   :  { %2283 = vtanh.f32 %v2560_v31  ;;  %v2563_v34 = vadd.f32 %v357_v33, %v349_v32 }
 0x4a4   :  { %2285 = vtanh.f32 %v2563_v34 }
 0x4ac   :  { %v2284_v40 = vpop.eup %2283 }
 0x4ad   :  { %443 = vrot.lane.b32.xlu1 %v2284_v40, %s2419_s21 }
 0x4ae   :  { %v2286_v41 = vpop.eup %2285 }
 0x4af   :  { %362 = vrot.lane.b32.xlu0 %v2286_v41, %s2422_s11 }
 0x51f   :  { %v444_v42 = vpop.permute.xlu1 %443 }
 0x520   :  { %v446_v43 = vmul.f32 %v2280_v23, %v444_v42 }
 0x521   :  { %v363_v44 = vpop.permute.xlu0 %362 }
 0x522   :  { %v447_v45 = vpack.c.bf16 %v446_v43, %v446_v43  ;;  %v365_v46 = vmul.f32 %v2282_v26, %v363_v44  ;;  %v657_v26 = vld [vmem:[%s2884_s4] sm:$0x3]  ;;  %v794_v43 = vld [vmem:[#allocation2 + $0x8] sm:$0xf0] }
 0x523   :  { %v714_v28 = vsel %vm83_vm0, %v657_v26, 0 }
 0x524   :  { %v366_v47 = vpack.c.bf16 %v365_v46, %v365_v46  ;;  %497 = vrot.lane.b32.xlu1 %v447_v45, %s2420_s28 }
 0x526   :  { %368 = vrot.lane.b32.xlu0 %v366_v47, %s2423_s15  ;;  %v796_v47 = vrot.slane %v794_v43, 4 }
 0x596   :  { %v498_v49 = vpop.permute.xlu1 %497 }
 0x597   :  { %2122 = vmatmul.mubr.msk.bf16.vlgmr.msra.gmra.mrb[16].mxu1 %vm70_vm1, %v498_v49 }
 0x598   :  { %v369_v51 = vpop.permute.xlu0 %368  ;;  %2133 = vmatprep.mubr.msk.bf16.mxu1 %vm2416_vm2, %v2415_v5  ;;  %2132 = vmatpush3.bf16.msra.mxu1 %v665_v27 }
 0x599   :  { %372 = vst.msk [vmem:[#allocation3] sm:$0xf] %vm371_vm5, %v369_v51  ;;  %2116 = vmatmul.mubr.msk.bf16.vlgmr.msra.gmra.mrb[8].mxu0 %vm238_vm6, %v369_v51  ;;  %2143 = vmatprep.subr.bf16.mxu1 %v2415_v5  ;;  %v798_v51 = vunpack.c.l.bf16 %v796_v47 }
 0x59a   :  { %2126 = vmatpush3.bf16.msra.mxu0 %v589_v50  ;;  %2127 = vmatprep.mubr.msk.bf16.mxu0 %vm2416_vm2, %v2415_v5 }
 0x59b   :  { %2137 = vmatprep.subr.bf16.mxu0 %v2415_v5 }
 0x5a1   :  { %2128 = vmatmul.mubr.msk.bf16.vlgmr.msra.gmra.mrb[12].mxu0 %vm70_vm1, %v498_v49 }
 0x5a2   :  { %2139 = vmatprep.mubr.msk.bf16.mxu0 %vm2416_vm2, %v2415_v5  ;;  %2138 = vmatpush3.bf16.msra.mxu0 %v714_v28 }
 0x5a3   :  { %2149 = vmatprep.subr.bf16.mxu0 %v2415_v5 }
 0x66a   :  { %v539_v52 = vpop.f32.mrb[16].mxu1 }
 0x66b   :  { %v2123_v53 = vpop.f32.mrb[17].mxu1 }
 0x66c   :  { %v490_v54 = vpop.f32.mrb[8].mxu0  ;;  %v542_v55 = vpop.f32.mrb[18].mxu1 }
 0x66d   :  { %v540_v56 = vadd.f32 %v539_v52, %v490_v54  ;;  %v2117_v57 = vpop.f32.mrb[9].mxu0  ;;  %v2124_v58 = vpop.f32.mrb[19].mxu1 }
 0x66e   :  { %v493_v59 = vpop.f32.mrb[10].mxu0 }
 0x66f   :  { %v552_v60 = vadd.f32 %v2552_v3, %v540_v56  ;;  %v2118_v61 = vpop.f32.mrb[11].mxu0 }
 0x671   :  { %2287 = vtanh.f32 %v552_v60  ;;  %v1979_v8 = vmul.f32 -1.442695, %v552_v60 }
 0x674   :  { %v625_v63 = vpop.f32.mrb[12].mxu0 }
 0x675   :  { %v631_v0 = vadd.f32 %v625_v63, %v586_v62  ;;  %v2129_v1 = vpop.f32.mrb[13].mxu0 }
 0x676   :  { %v628_v2 = vpop.f32.mrb[14].mxu0 }
 0x677   :  { %2289 = vtanh.f32 %v631_v0  ;;  %v2130_v4 = vpop.f32.mrb[15].mxu0  ;;  %v1981_v9 = vmul.f32 -1.442695, %v631_v0 }
 0x678   :  { %2291 = vpow2.f32 %v1979_v8 }
 0x679   :  { %2293 = vpow2.f32 %v1981_v9 }
 0x67b   :  { %v2288_v6 = vpop.eup %2287 }
 0x67c   :  { %562 = vrot.lane.b32.xlu0 %v2288_v6, %s2421_s10 }
 0x681   :  { %v2290_v7 = vpop.eup %2289 }
 0x682   :  { %641 = vrot.lane.b32.xlu1 %v2290_v7, %s2418_s3  ;;  %v2292_v10 = vpop.eup %2291 }
 0x683   :  { %v556_v11 = vadd.f32 1.0, %v2292_v10  ;;  %v2294_v12 = vpop.eup %2293 }
 0x684   :  { %v635_v35 = vadd.f32 1.0, %v2294_v12 }
 0x685   :  { %2295 = vrcp.f32 %v556_v11 }
 0x686   :  { %2297 = vrcp.f32 %v635_v35 }
 0x68f   :  { %v2296_v13 = vpop.eup %2295 }
 0x690   :  { %v2298_v16 = vpop.eup %2297  ;;  %v560_v19 = vmul.f32 %v2296_v13, %v2563_v34 }
 0x691   :  { %v639_v22 = vmul.f32 %v2298_v16, %v2560_v31 }
 0x6ee   :  { %v563_v14 = vpop.permute.xlu0 %562 }
 0x6ef   :  { %v565_v15 = vmul.f32 %v2296_v13, %v563_v14 }
 0x6f1   :  { %567 = vrot.lane.b32.xlu0 %v565_v15, %s2422_s11 }
 0x6f4   :  { %v642_v17 = vpop.permute.xlu1 %641 }
 0x6f5   :  { %v644_v18 = vmul.f32 %v2298_v16, %v642_v17  ;;  %v870_v17 = vld [vmem:[%s2885_s5] sm:$0xf] }
 0x6f7   :  { %646 = vrot.lane.b32.xlu1 %v644_v18, %s2419_s21  ;;  %v869_v18 = vld [vmem:[%s2884_s4] sm:$0x3] }
 0x763   :  { %v568_v20 = vpop.permute.xlu0 %567 }
 0x764   :  { %v2602_v21 = vadd.f32 %v568_v20, %v560_v19  ;;  %v875_v19 = vsel %vm241_vm4, %v870_v17, 0  ;;  %v924_v20 = vsel %vm83_vm0, %v869_v18, 0 }
 0x766   :  { %2299 = vtanh.f32 %v2602_v21 }
 0x769   :  { %v647_v23 = vpop.permute.xlu1 %646 }
 0x76a   :  { %v2606_v24 = vadd.f32 %v647_v23, %v639_v22 }
 0x76c   :  { %2301 = vtanh.f32 %v2606_v24 }
 0x770   :  { %v2300_v29 = vpop.eup %2299 }
 0x771   :  { %573 = vrot.lane.b32.xlu0 %v2300_v29, %s2422_s11  ;;  %v1007_v29 = vld [vmem:[%s2882_s2] sm:$0x3] }
 0x776   :  { %v2302_v30 = vpop.eup %2301 }
 0x777   :  { %652 = vrot.lane.b32.xlu1 %v2302_v30, %s2419_s21  ;;  %v1009_v30 = vsel %vm83_vm0, %v1007_v29, 0 }
 0x7e3   :  { %v574_v31 = vpop.permute.xlu0 %573 }
 0x7e4   :  { %v576_v32 = vmul.f32 %v2296_v13, %v574_v31 }
 0x7e6   :  { %v2621_v33 = vpack.c.bf16 %v576_v32, %v576_v32 }
 0x7e8   :  { %659 = vrot.lane.b32.xlu0 %v2621_v33, %s2423_s15 }
 0x7e9   :  { %v653_v34 = vpop.permute.xlu1 %652 }
 0x7ea   :  { %v655_v36 = vmul.f32 %v2298_v16, %v653_v34 }
 0x7ec   :  { %v656_v37 = vpack.c.bf16 %v655_v36, %v655_v36 }
 0x7ee   :  { %708 = vrot.lane.b32.xlu1 %v656_v37, %s2420_s28 }
 0x85a   :  { %v660_v40 = vpop.permute.xlu0 %659 }
 0x85b   :  { %2134 = vmatmul.mubr.msk.bf16.vlgmr.msra.gmra.mrb[20].mxu1 %vm238_vm6, %v660_v40 }
 0x85c   :  { %2144 = vmatpush3.bf16.msra.mxu1 %v801_v39  ;;  %2145 = vmatprep.mubr.msk.bf16.mxu1 %vm2416_vm2, %v2415_v5 }
 0x85d   :  { %2155 = vmatprep.subr.bf16.mxu1 %v2415_v5 }
 0x860   :  { %v709_v41 = vpop.permute.xlu1 %708 }
 0x861   :  { %2140 = vmatmul.mubr.msk.bf16.vlgmr.msra.gmra.mrb[16].mxu0 %vm70_vm1, %v709_v41 }
 0x862   :  { %2151 = vmatprep.mubr.msk.bf16.mxu0 %vm2416_vm2, %v2415_v5  ;;  %2150 = vmatpush3.bf16.msra.mxu0 %v875_v19 }
 0x863   :  { %2146 = vmatmul.mubr.msk.bf16.vlgmr.msra.gmra.mrb[24].mxu1 %vm70_vm1, %v709_v41  ;;  %2161 = vmatprep.subr.bf16.mxu0 %v2415_v5 }
 0x864   :  { %2157 = vmatprep.mubr.msk.bf16.mxu1 %vm2416_vm2, %v2415_v5  ;;  %2156 = vmatpush3.bf16.msra.mxu1 %v924_v20 }
 0x865   :  { %2167 = vmatprep.subr.bf16.mxu1 %v2415_v5 }
 0x92e   :  { %v701_v42 = vpop.f32.mrb[20].mxu1 }
 0x92f   :  { %v2135_v44 = vpop.f32.mrb[21].mxu1 }
 0x930   :  { %v704_v45 = vpop.f32.mrb[22].mxu1 }
 0x931   :  { %v2136_v46 = vpop.f32.mrb[23].mxu1  ;;  %v2683_v45 = vld [vmem:[#allocation2 + $0x10] ss:$8 sps:$4 sm:$0xff]  }
 0x932   :  { %v1006_v46 = vunpack.c.l.bf16 %v2683_v45 }
 0x934   :  { %v750_v48 = vpop.f32.mrb[16].mxu0 }
 0x935   :  { %v751_v49 = vadd.f32 %v750_v48, %v701_v42  ;;  %v2141_v50 = vpop.f32.mrb[17].mxu0 }
 0x936   :  { %v753_v52 = vpop.f32.mrb[18].mxu0  ;;  %v837_v53 = vpop.f32.mrb[24].mxu1 }
 0x937   :  { %v763_v54 = vadd.f32 %v2552_v3, %v751_v49  ;;  %v843_v55 = vadd.f32 %v837_v53, %v798_v51  ;;  %v2142_v56 = vpop.f32.mrb[19].mxu0  ;;  %v2147_v57 = vpop.f32.mrb[25].mxu1 }
 0x938   :  { %v840_v58 = vpop.f32.mrb[26].mxu1 }
 0x939   :  { %2303 = vtanh.f32 %v763_v54  ;;  %v2148_v59 = vpop.f32.mrb[27].mxu1  ;;  %v1985_v62 = vmul.f32 -1.442695, %v763_v54  ;;  %v1987_v63 = vmul.f32 -1.442695, %v843_v55 }
 0x93a   :  { %2305 = vtanh.f32 %v843_v55 }
 0x93b   :  { %2307 = vpow2.f32 %v1985_v62 }
 0x93c   :  { %2309 = vpow2.f32 %v1987_v63 }
 0x943   :  { %v2304_v60 = vpop.eup %2303 }
 0x944   :  { %v2306_v61 = vpop.eup %2305  ;;  %773 = vrot.lane.b32.xlu0 %v2304_v60, %s2421_s10 }
 0x945   :  { %853 = vrot.lane.b32.xlu1 %v2306_v61, %s2418_s3  ;;  %v2308_v0 = vpop.eup %2307 }
 0x946   :  { %v2310_v1 = vpop.eup %2309  ;;  %v767_v2 = vadd.f32 1.0, %v2308_v0 }
 0x947   :  { %v847_v4 = vadd.f32 1.0, %v2310_v1 }
 0x948   :  { %2311 = vrcp.f32 %v767_v2 }
 0x949   :  { %2313 = vrcp.f32 %v847_v4 }
 0x952   :  { %v2312_v6 = vpop.eup %2311 }
 0x953   :  { %v2314_v8 = vpop.eup %2313  ;;  %v771_v12 = vmul.f32 %v2312_v6, %v2602_v21 }
 0x954   :  { %v851_v35 = vmul.f32 %v2314_v8, %v2606_v24 }
 0x9b6   :  { %v774_v7 = vpop.permute.xlu0 %773 }
 0x9b7   :  { %v854_v9 = vpop.permute.xlu1 %853  ;;  %v776_v10 = vmul.f32 %v2312_v6, %v774_v7 }
 0x9b8   :  { %v856_v11 = vmul.f32 %v2314_v8, %v854_v9 }
 0x9b9   :  { %778 = vrot.lane.b32.xlu0 %v776_v10, %s2422_s11  ;;  %v1078_v10 = vld [vmem:[%s2885_s5] sm:$0xf] }
 0x9ba   :  { %858 = vrot.lane.b32.xlu1 %v856_v11, %s2419_s21  ;;  %v1077_v11 = vld [vmem:[%s2884_s4] sm:$0x3] }
 0xa2b   :  { %v779_v13 = vpop.permute.xlu0 %778 }
 0xa2c   :  { %v859_v14 = vpop.permute.xlu1 %858  ;;  %v2647_v15 = vadd.f32 %v779_v13, %v771_v12  ;;  %v1085_v12 = vsel %vm241_vm4, %v1078_v10, 0 }
 0xa2d   :  { %v2649_v16 = vadd.f32 %v859_v14, %v851_v35  ;;  %v1134_v35 = vsel %vm83_vm0, %v1077_v11, 0 }
 0xa2e   :  { %2315 = vtanh.f32 %v2647_v15 }
 0xa2f   :  { %2317 = vtanh.f32 %v2649_v16 }
 0xa38   :  { %v2316_v21 = vpop.eup %2315 }
 0xa39   :  { %v2318_v22 = vpop.eup %2317  ;;  %784 = vrot.lane.b32.xlu0 %v2316_v21, %s2422_s11  ;;  %v1219_v21 = vld [vmem:[%s2882_s2] sm:$0x3] }
 0xa3a   :  { %864 = vrot.lane.b32.xlu1 %v2318_v22, %s2419_s21  ;;  %v1221_v22 = vsel %vm83_vm0, %v1219_v21, 0 }
 0xaab   :  { %v785_v23 = vpop.permute.xlu0 %784 }
 0xaac   :  { %v865_v24 = vpop.permute.xlu1 %864  ;;  %v787_v25 = vmul.f32 %v2312_v6, %v785_v23 }
 0xaad   :  { %v867_v26 = vmul.f32 %v2314_v8, %v865_v24 }
 0xaae   :  { %v788_v27 = vpack.c.bf16 %v787_v25, %v787_v25 }
 0xaaf   :  { %v868_v28 = vpack.c.bf16 %v867_v26, %v867_v26  ;;  %v1214_v26 = vld [vmem:[#allocation2 + $0x10] sm:$0xf0] }
 0xab0   :  { %790 = vrot.lane.b32.xlu0 %v788_v27, %s2423_s15 }
 0xab1   :  { %918 = vrot.lane.b32.xlu1 %v868_v28, %s2420_s28 }
 0xb22   :  { %v791_v31 = vpop.permute.xlu0 %790 }
 0xb23   :  { %v919_v32 = vpop.permute.xlu1 %918  ;;  %793 = vst.msk [vmem:[#allocation3 + $0x8] sm:$0xf] %vm371_vm5, %v791_v31  ;;  %2152 = vmatmul.mubr.msk.bf16.vlgmr.msra.gmra.mrb[20].mxu0 %vm238_vm6, %v791_v31 }
 0xb24   :  { %2158 = vmatmul.mubr.msk.bf16.vlgmr.msra.gmra.mrb[28].mxu1 %vm70_vm1, %v919_v32  ;;  %2162 = vmatpush3.bf16.msra.mxu0 %v1009_v30  ;;  %v1216_v30 = vrot.slane %v1214_v26, 4 }
 0xb25   :  { %2163 = vmatprep.mubr.msk.bf16.mxu0 %vm2416_vm2, %v2415_v5  ;;  %2173 = vmatprep.subr.bf16.mxu0 %v2415_v5 }
 0xb26   :  { %2169 = vmatprep.mubr.msk.bf16.mxu1 %vm2416_vm2, %v2415_v5  ;;  %2168 = vmatpush3.bf16.msra.mxu1 %v1085_v12 }
 0xb27   :  { %2179 = vmatprep.subr.bf16.mxu1 %v2415_v5 }
 0xb2b   :  { %2164 = vmatmul.mubr.msk.bf16.vlgmr.msra.gmra.mrb[24].mxu0 %vm70_vm1, %v919_v32 }
 0xb2c   :  { %2175 = vmatprep.mubr.msk.bf16.mxu0 %vm2416_vm2, %v2415_v5  ;;  %2174 = vmatpush3.bf16.msra.mxu0 %v1134_v35 }
 0xb2d   :  { %2185 = vmatprep.subr.bf16.mxu0 %v2415_v5 }
 0xbf6   :  { %v911_v34 = vpop.f32.mrb[20].mxu0 }
 0xbf7   :  { %v960_v36 = vpop.f32.mrb[28].mxu1  ;;  %v2153_v37 = vpop.f32.mrb[21].mxu0 }
 0xbf8   :  { %v961_v38 = vadd.f32 %v960_v36, %v911_v34  ;;  %v2159_v39 = vpop.f32.mrb[29].mxu1  ;;  %v914_v40 = vpop.f32.mrb[22].mxu0  ;;  %v1218_v37 = vunpack.c.l.bf16 %v1216_v30  ;;  %v1426_v30 = vunpack.c.h.bf16 %v2683_v45 }
 0xbf9   :  { %v963_v41 = vpop.f32.mrb[30].mxu1  ;;  %v2154_v42 = vpop.f32.mrb[23].mxu0 }
 0xbfa   :  { %v973_v43 = vadd.f32 %v2552_v3, %v961_v38  ;;  %v2160_v44 = vpop.f32.mrb[31].mxu1 }
 0xbfc   :  { %2319 = vtanh.f32 %v973_v43  ;;  %v1991_v54 = vmul.f32 -1.442695, %v973_v43 }
 0xbfe   :  { %v1045_v47 = vpop.f32.mrb[24].mxu0 }
 0xbff   :  { %v1051_v48 = vadd.f32 %v1045_v47, %v1006_v46  ;;  %v2165_v49 = vpop.f32.mrb[25].mxu0 }
 0xc00   :  { %v1048_v50 = vpop.f32.mrb[26].mxu0 }
 0xc01   :  { %2321 = vtanh.f32 %v1051_v48  ;;  %v2166_v51 = vpop.f32.mrb[27].mxu0  ;;  %v1993_v55 = vmul.f32 -1.442695, %v1051_v48 }
 0xc02   :  { %2323 = vpow2.f32 %v1991_v54 }
 0xc03   :  { %2325 = vpow2.f32 %v1993_v55 }
 0xc06   :  { %v2320_v52 = vpop.eup %2319 }
 0xc07   :  { %983 = vrot.lane.b32.xlu0 %v2320_v52, %s2421_s10 }
 0xc0b   :  { %v2322_v53 = vpop.eup %2321 }
 0xc0c   :  { %1061 = vrot.lane.b32.xlu1 %v2322_v53, %s2418_s3  ;;  %v2324_v56 = vpop.eup %2323 }
 0xc0d   :  { %v977_v57 = vadd.f32 1.0, %v2324_v56  ;;  %v2326_v58 = vpop.eup %2325 }
 0xc0e   :  { %v1055_v59 = vadd.f32 1.0, %v2326_v58 }
 0xc0f   :  { %2327 = vrcp.f32 %v977_v57 }
 0xc10   :  { %2329 = vrcp.f32 %v1055_v59 }
 0xc19   :  { %v2328_v60 = vpop.eup %2327 }
 0xc1a   :  { %v2330_v63 = vpop.eup %2329  ;;  %v981_v2 = vmul.f32 %v2328_v60, %v2647_v15 }
 0xc1b   :  { %v1059_v7 = vmul.f32 %v2330_v63, %v2649_v16 }
 0xc79   :  { %v984_v61 = vpop.permute.xlu0 %983 }
 0xc7a   :  { %v986_v62 = vmul.f32 %v2328_v60, %v984_v61 }
 0xc7c   :  { %988 = vrot.lane.b32.xlu0 %v986_v62, %s2422_s11 }
 0xc7e   :  { %v1062_v0 = vpop.permute.xlu1 %1061 }
 0xc7f   :  { %v1064_v1 = vmul.f32 %v2330_v63, %v1062_v0 }
 0xc81   :  { %1066 = vrot.lane.b32.xlu1 %v1064_v1, %s2419_s21 }
 0xcee   :  { %v989_v4 = vpop.permute.xlu0 %988 }
 0xcef   :  { %v2691_v6 = vadd.f32 %v989_v4, %v981_v2  ;;  %v1290_v2 = vld [vmem:[%s2885_s5] sm:$0xf] }
 0xcf0   :  { %v1289_v4 = vld [vmem:[%s2884_s4] sm:$0x3] }
 0xcf1   :  { %2331 = vtanh.f32 %v2691_v6 }
 0xcf3   :  { %v1067_v8 = vpop.permute.xlu1 %1066 }
 0xcf4   :  { %v2695_v9 = vadd.f32 %v1067_v8, %v1059_v7  ;;  %v1344_v7 = vsel %vm83_vm0, %v1289_v4, 0 }
 0xcf6   :  { %2333 = vtanh.f32 %v2695_v9 }
 0xcfb   :  { %v2332_v13 = vpop.eup %2331 }
 0xcfc   :  { %994 = vrot.lane.b32.xlu0 %v2332_v13, %s2422_s11 }
 0xd00   :  { %v2334_v14 = vpop.eup %2333 }
 0xd01   :  { %1072 = vrot.lane.b32.xlu1 %v2334_v14, %s2419_s21 }
 0xd6e   :  { %v995_v15 = vpop.permute.xlu0 %994 }
 0xd6f   :  { %v997_v16 = vmul.f32 %v2328_v60, %v995_v15  ;;  %v1427_v15 = vld [vmem:[%s2882_s2] sm:$0x3] }
 0xd71   :  { %v2710_v17 = vpack.c.bf16 %v997_v16, %v997_v16  ;;  %v1429_v16 = vsel %vm83_vm0, %v1427_v15, 0 }
 0xd73   :  { %1079 = vrot.lane.b32.xlu0 %v2710_v17, %s2423_s15  ;;  %v1073_v18 = vpop.permute.xlu1 %1072 }
 0xd74   :  { %v1075_v19 = vmul.f32 %v2330_v63, %v1073_v18 }
 0xd76   :  { %v1076_v20 = vpack.c.bf16 %v1075_v19, %v1075_v19 }
 0xd78   :  { %1128 = vrot.lane.b32.xlu1 %v1076_v20, %s2420_s28 }
 0xde5   :  { %v1080_v23 = vpop.permute.xlu0 %1079 }
 0xde6   :  { %2170 = vmatmul.mubr.msk.bf16.vlgmr.msra.gmra.mrb[32].mxu1 %vm238_vm6, %v1080_v23 }
 0xde7   :  { %2180 = vmatpush3.bf16.msra.mxu1 %v1221_v22  ;;  %2181 = vmatprep.mubr.msk.bf16.mxu1 %vm2416_vm2, %v2415_v5 }
 0xde8   :  { %2191 = vmatprep.subr.bf16.mxu1 %v2415_v5 }
 0xdea   :  { %v1129_v24 = vpop.permute.xlu1 %1128 }
 0xdeb   :  { %2176 = vmatmul.mubr.msk.bf16.vlgmr.msra.gmra.mrb[28].mxu0 %vm70_vm1, %v1129_v24 }
 0xdec   :  { %2187 = vmatprep.mubr.msk.bf16.mxu0 %vm2416_vm2, %v2415_v5 }
 0xdee   :  { %2182 = vmatmul.mubr.msk.bf16.vlgmr.msra.gmra.mrb[36].mxu1 %vm70_vm1, %v1129_v24 }
 0xdef   :  { %2193 = vmatprep.mubr.msk.bf16.mxu1 %vm2416_vm2, %v2415_v5  ;;  %2192 = vmatpush3.bf16.msra.mxu1 %v1344_v7 }
 0xdf0   :  { %2203 = vmatprep.subr.bf16.mxu1 %v2415_v5 }
 0xeb9   :  { %v1121_v25 = vpop.f32.mrb[32].mxu1 }
 0xeba   :  { %v2171_v27 = vpop.f32.mrb[33].mxu1 }
 0xebb   :  { %v1124_v28 = vpop.f32.mrb[34].mxu1 }
 0xebc   :  { %v2172_v29 = vpop.f32.mrb[35].mxu1 }
 0xebe   :  { %v1170_v31 = vpop.f32.mrb[28].mxu0 }
 0xebf   :  { %v1171_v32 = vadd.f32 %v1170_v31, %v1121_v25  ;;  %v2177_v34 = vpop.f32.mrb[29].mxu0 }
 0xec0   :  { %v1173_v36 = vpop.f32.mrb[30].mxu0 }
 0xec1   :  { %v1183_v38 = vadd.f32 %v2552_v3, %v1171_v32  ;;  %v1257_v39 = vpop.f32.mrb[36].mxu1  ;;  %v2178_v40 = vpop.f32.mrb[31].mxu0 }
 0xec2   :  { %v1263_v41 = vadd.f32 %v1257_v39, %v1218_v37  ;;  %v2183_v42 = vpop.f32.mrb[37].mxu1 }
 0xec3   :  { %2335 = vtanh.f32 %v1183_v38  ;;  %v1260_v43 = vpop.f32.mrb[38].mxu1  ;;  %v1997_v48 = vmul.f32 -1.442695, %v1183_v38 }
 0xec4   :  { %2337 = vtanh.f32 %v1263_v41  ;;  %v2184_v44 = vpop.f32.mrb[39].mxu1  ;;  %v1999_v49 = vmul.f32 -1.442695, %v1263_v41 }
 0xec5   :  { %2339 = vpow2.f32 %v1997_v48 }
 0xec6   :  { %2341 = vpow2.f32 %v1999_v49 }
 0xecd   :  { %v2336_v46 = vpop.eup %2335 }
 0xece   :  { %v2338_v47 = vpop.eup %2337  ;;  %1193 = vrot.lane.b32.xlu0 %v2336_v46, %s2421_s10 }
 0xecf   :  { %1273 = vrot.lane.b32.xlu1 %v2338_v47, %s2418_s3  ;;  %v2340_v50 = vpop.eup %2339 }
 0xed0   :  { %v2342_v51 = vpop.eup %2341  ;;  %v1187_v52 = vadd.f32 1.0, %v2340_v50 }
 0xed1   :  { %v1267_v53 = vadd.f32 1.0, %v2342_v51 }
 0xed2   :  { %2343 = vrcp.f32 %v1187_v52 }
 0xed3   :  { %2345 = vrcp.f32 %v1267_v53 }
 0xedc   :  { %v2344_v54 = vpop.eup %2343 }
 0xedd   :  { %v2346_v56 = vpop.eup %2345  ;;  %v1191_v60 = vmul.f32 %v2344_v54, %v2691_v6  ;;  %v1295_v6 = vsel %vm241_vm4, %v1290_v2, 0 }
 0xede   :  { %v1271_v61 = vmul.f32 %v2346_v56, %v2695_v9  ;;  %2186 = vmatpush3.bf16.msra.mxu0 %v1295_v6 }
 0xedf   :  { %2197 = vmatprep.subr.bf16.mxu0 %v2415_v5 }
 0xf40   :  { %v1194_v55 = vpop.permute.xlu0 %1193 }
 0xf41   :  { %v1274_v57 = vpop.permute.xlu1 %1273  ;;  %v1196_v58 = vmul.f32 %v2344_v54, %v1194_v55 }
 0xf42   :  { %v1276_v59 = vmul.f32 %v2346_v56, %v1274_v57 }
 0xf43   :  { %1198 = vrot.lane.b32.xlu0 %v1196_v58, %s2422_s11  ;;  %v1498_v58 = vld [vmem:[%s2885_s5] sm:$0xf] }
 0xf44   :  { %1278 = vrot.lane.b32.xlu1 %v1276_v59, %s2419_s21  ;;  %v1497_v59 = vld [vmem:[%s2884_s4] sm:$0x3] }
 0xfb5   :  { %v1199_v62 = vpop.permute.xlu0 %1198 }
 0xfb6   :  { %v1279_v63 = vpop.permute.xlu1 %1278  ;;  %v2736_v0 = vadd.f32 %v1199_v62, %v1191_v60  ;;  %v1505_v60 = vsel %vm241_vm4, %v1498_v58, 0 }
 0xfb7   :  { %v2738_v1 = vadd.f32 %v1279_v63, %v1271_v61  ;;  %v1554_v61 = vsel %vm83_vm0, %v1497_v59, 0 }
 0xfb8   :  { %2347 = vtanh.f32 %v2736_v0 }
 0xfb9   :  { %2349 = vtanh.f32 %v2738_v1 }
 0xfc2   :  { %v2348_v8 = vpop.eup %2347 }
 0xfc3   :  { %v2350_v9 = vpop.eup %2349  ;;  %1204 = vrot.lane.b32.xlu0 %v2348_v8, %s2422_s11  ;;  %v1639_v8 = vld [vmem:[%s2882_s2] sm:$0x3] }
 0xfc4   :  { %1284 = vrot.lane.b32.xlu1 %v2350_v9, %s2419_s21  ;;  %v1641_v9 = vsel %vm83_vm0, %v1639_v8, 0 }
0x1035   :  { %v1205_v10 = vpop.permute.xlu0 %1204 }
0x1036   :  { %v1285_v11 = vpop.permute.xlu1 %1284  ;;  %v1207_v12 = vmul.f32 %v2344_v54, %v1205_v10 }
0x1037   :  { %v1287_v35 = vmul.f32 %v2346_v56, %v1285_v11 }
0x1038   :  { %v1208_v13 = vpack.c.bf16 %v1207_v12, %v1207_v12 }
0x1039   :  { %v1288_v14 = vpack.c.bf16 %v1287_v35, %v1287_v35  ;;  %v1634_v35 = vld [vmem:[#allocation2 + $0x18] sm:$0xf0] }
0x103a   :  { %1210 = vrot.lane.b32.xlu0 %v1208_v13, %s2423_s15 }
0x103b   :  { %1338 = vrot.lane.b32.xlu1 %v1288_v14, %s2420_s28 }
0x10ac   :  { %v1211_v18 = vpop.permute.xlu0 %1210 }
0x10ad   :  { %v1339_v19 = vpop.permute.xlu1 %1338  ;;  %1213 = vst.msk [vmem:[#allocation3 + $0x10] sm:$0xf] %vm371_vm5, %v1211_v18  ;;  %2188 = vmatmul.mubr.msk.bf16.vlgmr.msra.gmra.mrb[32].mxu0 %vm238_vm6, %v1211_v18 }
0x10ae   :  { %2194 = vmatmul.mubr.msk.bf16.vlgmr.msra.gmra.mrb[40].mxu1 %vm70_vm1, %v1339_v19  ;;  %2198 = vmatpush3.bf16.msra.mxu0 %v1429_v16  ;;  %v1636_v16 = vrot.slane %v1634_v35, 4 }
0x10af   :  { %2199 = vmatprep.mubr.msk.bf16.mxu0 %vm2416_vm2, %v2415_v5  ;;  %2209 = vmatprep.subr.bf16.mxu0 %v2415_v5 }
0x10b0   :  { %2205 = vmatprep.mubr.msk.bf16.mxu1 %vm2416_vm2, %v2415_v5  ;;  %2204 = vmatpush3.bf16.msra.mxu1 %v1505_v60 }
0x10b1   :  { %2215 = vmatprep.subr.bf16.mxu1 %v2415_v5 }
0x10b5   :  { %2200 = vmatmul.mubr.msk.bf16.vlgmr.msra.gmra.mrb[36].mxu0 %vm70_vm1, %v1339_v19 }
0x10b6   :  { %2211 = vmatprep.mubr.msk.bf16.mxu0 %vm2416_vm2, %v2415_v5  ;;  %2210 = vmatpush3.bf16.msra.mxu0 %v1554_v61 }
0x10b7   :  { %2221 = vmatprep.subr.bf16.mxu0 %v2415_v5 }
0x1180   :  { %v1331_v20 = vpop.f32.mrb[32].mxu0 }
0x1181   :  { %v1380_v21 = vpop.f32.mrb[40].mxu1  ;;  %v2189_v22 = vpop.f32.mrb[33].mxu0 }
0x1182   :  { %v1381_v23 = vadd.f32 %v1380_v21, %v1331_v20  ;;  %v2195_v24 = vpop.f32.mrb[41].mxu1  ;;  %v1334_v25 = vpop.f32.mrb[34].mxu0  ;;  %v1638_v22 = vunpack.c.l.bf16 %v1636_v16 }
0x1183   :  { %v1383_v26 = vpop.f32.mrb[42].mxu1  ;;  %v2190_v27 = vpop.f32.mrb[35].mxu0 }
0x1184   :  { %v1393_v28 = vadd.f32 %v2552_v3, %v1381_v23  ;;  %v2196_v29 = vpop.f32.mrb[43].mxu1 }
0x1186   :  { %2351 = vtanh.f32 %v1393_v28  ;;  %v2003_v40 = vmul.f32 -1.442695, %v1393_v28 }
0x1188   :  { %v1465_v31 = vpop.f32.mrb[36].mxu0 }
0x1189   :  { %v1471_v32 = vadd.f32 %v1465_v31, %v1426_v30  ;;  %v2201_v34 = vpop.f32.mrb[37].mxu0 }
0x118a   :  { %v1468_v36 = vpop.f32.mrb[38].mxu0 }
0x118b   :  { %2353 = vtanh.f32 %v1471_v32  ;;  %v2202_v37 = vpop.f32.mrb[39].mxu0  ;;  %v2005_v41 = vmul.f32 -1.442695, %v1471_v32 }
0x118c   :  { %2355 = vpow2.f32 %v2003_v40 }
0x118d   :  { %2357 = vpow2.f32 %v2005_v41 }
0x1190   :  { %v2352_v38 = vpop.eup %2351 }
0x1191   :  { %1403 = vrot.lane.b32.xlu0 %v2352_v38, %s2421_s10 }
0x1195   :  { %v2354_v39 = vpop.eup %2353 }
0x1196   :  { %1481 = vrot.lane.b32.xlu1 %v2354_v39, %s2418_s3  ;;  %v2356_v42 = vpop.eup %2355 }
0x1197   :  { %v1397_v43 = vadd.f32 1.0, %v2356_v42  ;;  %v2358_v44 = vpop.eup %2357 }
0x1198   :  { %v1475_v45 = vadd.f32 1.0, %v2358_v44 }
0x1199   :  { %2359 = vrcp.f32 %v1397_v43 }
0x119a   :  { %2361 = vrcp.f32 %v1475_v45 }
0x11a3   :  { %v2360_v46 = vpop.eup %2359 }
0x11a4   :  { %v2362_v49 = vpop.eup %2361  ;;  %v1401_v52 = vmul.f32 %v2360_v46, %v2736_v0 }
0x11a5   :  { %v1479_v55 = vmul.f32 %v2362_v49, %v2738_v1 }
0x1203   :  { %v1404_v47 = vpop.permute.xlu0 %1403 }
0x1204   :  { %v1406_v48 = vmul.f32 %v2360_v46, %v1404_v47 }
0x1206   :  { %1408 = vrot.lane.b32.xlu0 %v1406_v48, %s2422_s11 }
0x1208   :  { %v1482_v50 = vpop.permute.xlu1 %1481 }
0x1209   :  { %v1484_v51 = vmul.f32 %v2362_v49, %v1482_v50  ;;  %v1710_v50 = vld [vmem:[%s2885_s5] sm:$0xf] }
0x120b   :  { %1486 = vrot.lane.b32.xlu1 %v1484_v51, %s2419_s21  ;;  %v1709_v51 = vld [vmem:[%s2884_s4] sm:$0x3] }
0x1278   :  { %v1409_v53 = vpop.permute.xlu0 %1408 }
0x1279   :  { %v2778_v54 = vadd.f32 %v1409_v53, %v1401_v52  ;;  %v1715_v52 = vsel %vm241_vm4, %v1710_v50, 0  ;;  %v1764_v53 = vsel %vm83_vm0, %v1709_v51, 0 }
0x127b   :  { %2363 = vtanh.f32 %v2778_v54 }
0x127d   :  { %v1487_v56 = vpop.permute.xlu1 %1486 }
0x127e   :  { %v2782_v57 = vadd.f32 %v1487_v56, %v1479_v55 }
0x1280   :  { %2365 = vtanh.f32 %v2782_v57 }
0x1285   :  { %v2364_v62 = vpop.eup %2363 }
0x1286   :  { %1414 = vrot.lane.b32.xlu0 %v2364_v62, %s2422_s11 }
0x128a   :  { %v2366_v63 = vpop.eup %2365 }
0x128b   :  { %1492 = vrot.lane.b32.xlu1 %v2366_v63, %s2419_s21 }
0x12f8   :  { %v1415_v0 = vpop.permute.xlu0 %1414 }
0x12f9   :  { %v1417_v1 = vmul.f32 %v2360_v46, %v1415_v0 }
0x12fb   :  { %v2797_v2 = vpack.c.bf16 %v1417_v1, %v1417_v1 }
0x12fd   :  { %1499 = vrot.lane.b32.xlu0 %v2797_v2, %s2423_s15  ;;  %v1493_v4 = vpop.permute.xlu1 %1492 }
0x12fe   :  { %v1495_v6 = vmul.f32 %v2362_v49, %v1493_v4  ;;  %v2014_v4 = vld [vmem:[%s2886_s6] ss:$0 sm:$0xff] }
0x1300   :  { %v1496_v7 = vpack.c.bf16 %v1495_v6, %v1495_v6 }
0x1302   :  { %1548 = vrot.lane.b32.xlu1 %v1496_v7, %s2420_s28 }
0x136f   :  { %v1500_v10 = vpop.permute.xlu0 %1499 }
0x1370   :  { %2206 = vmatmul.mubr.msk.bf16.vlgmr.msra.gmra.mrb[44].mxu1 %vm238_vm6, %v1500_v10 }
0x1371   :  { %2216 = vmatpush3.bf16.msra.mxu1 %v1641_v9  ;;  %2217 = vmatprep.mubr.msk.bf16.mxu1 %vm2416_vm2, %v2415_v5 }
0x1372   :  { %2227 = vmatprep.subr.bf16.mxu1 %v2415_v5 }
0x1374   :  { %v1549_v11 = vpop.permute.xlu1 %1548 }
0x1375   :  { %2212 = vmatmul.mubr.msk.bf16.vlgmr.msra.gmra.mrb[40].mxu0 %vm70_vm1, %v1549_v11 }
0x1376   :  { %2223 = vmatprep.mubr.msk.bf16.mxu0 %vm2416_vm2, %v2415_v5  ;;  %2222 = vmatpush3.bf16.msra.mxu0 %v1715_v52 }
0x1378   :  { %2218 = vmatmul.mubr.msk.bf16.vlgmr.msra.gmra.mrb[48].mxu1 %vm70_vm1, %v1549_v11 }
0x1379   :  { %2229 = vmatprep.mubr.msk.bf16.mxu1 %vm2416_vm2, %v2415_v5  ;;  %2228 = vmatpush3.bf16.msra.mxu1 %v1764_v53 }
0x1443   :  { %v1541_v12 = vpop.f32.mrb[44].mxu1 }
0x1444   :  { %v2207_v13 = vpop.f32.mrb[45].mxu1 }
0x1445   :  { %v1544_v14 = vpop.f32.mrb[46].mxu1 }
0x1446   :  { %v2208_v15 = vpop.f32.mrb[47].mxu1 }
0x1448   :  { %v1590_v18 = vpop.f32.mrb[40].mxu0 }
0x1449   :  { %v1591_v19 = vadd.f32 %v1590_v18, %v1541_v12  ;;  %v2213_v20 = vpop.f32.mrb[41].mxu0 }
0x144a   :  { %v1593_v21 = vpop.f32.mrb[42].mxu0 }
0x144b   :  { %v1603_v23 = vadd.f32 %v2552_v3, %v1591_v19  ;;  %v1677_v24 = vpop.f32.mrb[48].mxu1  ;;  %v2214_v25 = vpop.f32.mrb[43].mxu0  ;;  %v579_v21 = vrot.slane %v2621_v33, 4 }
0x144c   :  { %v1683_v26 = vadd.f32 %v1677_v24, %v1638_v22  ;;  %v2219_v27 = vpop.f32.mrb[49].mxu1  ;;  %v1420_v22 = vrot.slane %v2797_v2, 4 }
0x144d   :  { %2367 = vtanh.f32 %v1603_v23  ;;  %v1680_v28 = vpop.f32.mrb[50].mxu1  ;;  %v2009_v31 = vmul.f32 -1.442695, %v1603_v23  ;;  %v1849_v27 = vld [vmem:[%s2887_s7] sm:$0xf] }
0x144e   :  { %2369 = vtanh.f32 %v1683_v26  ;;  %v2220_v5 = vpop.f32.mrb[51].mxu1  ;;  %v2011_v32 = vmul.f32 -1.442695, %v1683_v26  ;;  %2247 = vmatprep.subr.msk.bf16.mxu0 %vm241_vm4, %v1849_v27  ;;  %v1870_v33 = vsel %vm241_vm4, %v1849_v27, 0 }
0x144f   :  { %2371 = vpow2.f32 %v2009_v31 }
0x1450   :  { %2373 = vpow2.f32 %v2011_v32 }
0x1457   :  { %v2368_v29 = vpop.eup %2367 }
0x1458   :  { %v2370_v30 = vpop.eup %2369  ;;  %1613 = vrot.lane.b32.xlu0 %v2368_v29, %s2421_s10  ;;  %v1000_v29 = vrot.slane %v2710_v17, 4 }
0x1459   :  { %1693 = vrot.lane.b32.xlu1 %v2370_v30, %s2418_s3  ;;  %v2372_v34 = vpop.eup %2371 }
0x145a   :  { %v2374_v3 = vpop.eup %2373  ;;  %v1607_v36 = vadd.f32 1.0, %v2372_v34 }
0x145b   :  { %v1687_v37 = vadd.f32 1.0, %v2374_v3 }
0x145c   :  { %2375 = vrcp.f32 %v1607_v36 }
0x145d   :  { %2377 = vrcp.f32 %v1687_v37 }
0x1466   :  { %v2376_v38 = vpop.eup %2375 }
0x1467   :  { %v2378_v40 = vpop.eup %2377  ;;  %v1611_v44 = vmul.f32 %v2376_v38, %v2778_v54 }
0x1468   :  { %v1691_v45 = vmul.f32 %v2378_v40, %v2782_v57 }
0x14ca   :  { %v1614_v39 = vpop.permute.xlu0 %1613 }
0x14cb   :  { %v1694_v41 = vpop.permute.xlu1 %1693  ;;  %v1616_v42 = vmul.f32 %v2376_v38, %v1614_v39  ;;  %v2016_v39 = vld [vmem:[%s2888_s8] ss:$0 sm:$0xff] }
0x14cc   :  { %v1696_v43 = vmul.f32 %v2378_v40, %v1694_v41 }
0x14cd   :  { %1618 = vrot.lane.b32.xlu0 %v1616_v42, %s2422_s11 }
0x14ce   :  { %1698 = vrot.lane.b32.xlu1 %v1696_v43, %s2419_s21 }
0x153f   :  { %v1619_v46 = vpop.permute.xlu0 %1618 }
0x1540   :  { %v1699_v47 = vpop.permute.xlu1 %1698  ;;  %v1621_v48 = vadd.f32 %v1619_v46, %v1611_v44 }
0x1541   :  { %v1701_v49 = vadd.f32 %v1699_v47, %v1691_v45 }
0x1542   :  { %2379 = vtanh.f32 %v1621_v48 }
0x1543   :  { %2381 = vtanh.f32 %v1701_v49 }
0x154c   :  { %v2380_v54 = vpop.eup %2379 }
0x154d   :  { %v2382_v55 = vpop.eup %2381  ;;  %1624 = vrot.lane.b32.xlu0 %v2380_v54, %s2422_s11 }
0x154e   :  { %1704 = vrot.lane.b32.xlu1 %v2382_v55, %s2419_s21 }
0x15bf   :  { %v1625_v56 = vpop.permute.xlu0 %1624 }
0x15c0   :  { %v1705_v57 = vpop.permute.xlu1 %1704  ;;  %v1627_v58 = vmul.f32 %v2376_v38, %v1625_v56 }
0x15c1   :  { %v1707_v59 = vmul.f32 %v2378_v40, %v1705_v57 }
0x15c2   :  { %v1628_v60 = vpack.c.bf16 %v1627_v58, %v1627_v58 }
0x15c3   :  { %v1708_v61 = vpack.c.bf16 %v1707_v59, %v1707_v59 }
0x15c4   :  { %1630 = vrot.lane.b32.xlu0 %v1628_v60, %s2423_s15 }
0x15c5   :  { %1758 = vrot.lane.b32.xlu1 %v1708_v61, %s2420_s28 }
0x1636   :  { %v1631_v62 = vpop.permute.xlu0 %1630 }
0x1637   :  { %v1759_v63 = vpop.permute.xlu1 %1758  ;;  %1633 = vst.msk [vmem:[#allocation3 + $0x18] sm:$0xf] %vm371_vm5, %v1631_v62  ;;  %2224 = vmatmul.mubr.msk.bf16.vlgmr.msra.gmra.mrb[44].mxu0 %vm238_vm6, %v1631_v62 }
0x1638   :  { %2230 = vmatmul.mubr.msk.bf16.vlgmr.msra.gmra.mrb[52].mxu1 %vm70_vm1, %v1759_v63  ;;  %2234 = vmatpush3.bf16.msra.mxu0 %v1870_v33 }
0x170a   :  { %v1751_v0 = vpop.f32.mrb[44].mxu0 }
0x170b   :  { %v1800_v1 = vpop.f32.mrb[52].mxu1  ;;  %v2225_v6 = vpop.f32.mrb[45].mxu0 }
0x170c   :  { %v1801_v7 = vadd.f32 %v1800_v1, %v1751_v0  ;;  %v2231_v8 = vpop.f32.mrb[53].mxu1  ;;  %v1754_v9 = vpop.f32.mrb[46].mxu0 }
0x170d   :  { %v1803_v10 = vpop.f32.mrb[54].mxu1  ;;  %v2226_v11 = vpop.f32.mrb[47].mxu0 }
0x170e   :  { %v1813_v12 = vadd.f32 %v2014_v4, %v1801_v7  ;;  %v2232_v35 = vpop.f32.mrb[55].mxu1 }
0x1710   :  { %2383 = vtanh.f32 %v1813_v12  ;;  %v2015_v14 = vmul.f32 -1.442695, %v1813_v12 }
0x1712   :  { %2385 = vpow2.f32 %v2015_v14 }
0x171a   :  { %v2384_v13 = vpop.eup %2383 }
0x171b   :  { %1823 = vrot.lane.b32.xlu0 %v2384_v13, %s2421_s10  ;;  %s2424_s10 = smov [#allocation4]  }
0x171c   :  { %v2386_v15 = vpop.eup %2385 }
0x171d   :  { %v1817_v16 = vadd.f32 1.0, %v2386_v15 }
0x171f   :  { %2387 = vrcp.f32 %v1817_v16 }
0x1729   :  { %v2388_v18 = vpop.eup %2387 }
0x172a   :  { %v1821_v23 = vmul.f32 %v2388_v18, %v1621_v48 }
0x178d   :  { %v1824_v19 = vpop.permute.xlu0 %1823 }
0x178e   :  { %v1826_v20 = vmul.f32 %v2388_v18, %v1824_v19 }
0x1790   :  { %1828 = vrot.lane.b32.xlu1 %v1826_v20, %s2422_s11 }
0x1794   :  { %580 = vrot.lane.b32.xlu1 %v579_v21, %s2423_s15 }
0x1798   :  { %1421 = vrot.lane.b32.xlu1 %v1420_v22, %s2423_s15 }
0x1802   :  { %v1829_v24 = vpop.permute.xlu1 %1828 }
0x1803   :  { %v1831_v25 = vadd.f32 %v1829_v24, %v1821_v23 }
0x1805   :  { %2389 = vtanh.f32 %v1831_v25 }
0x1806   :  { %v581_v26 = vpop.permute.xlu1 %580 }
0x1807   :  { %584 = vst.msk [vmem:[#allocation3] sm:$0xf0] %vm583_vm7, %v581_v26 }
0x180a   :  { %v1422_v28 = vpop.permute.xlu1 %1421 }
0x180b   :  { %1424 = vst.msk [vmem:[#allocation3 + $0x10] sm:$0xf0] %vm583_vm7, %v1422_v28 }
0x180e   :  { %v1845_v2 = vld [vmem:[#allocation3] sm:$0xff] }
0x180f   :  { %v2390_v5 = vpop.eup %2389  ;;  %2235 = vmatprep.mubr.msk.bf16.mxu0 %vm238_vm6, %v1845_v2 }
0x1810   :  { %1834 = vrot.lane.b32.xlu0 %v2390_v5, %s2422_s11 }
0x1812   :  { %v1847_v37 = vld [vmem:[#allocation3 + $0x10] sm:$0xff] }
0x1814   :  { %1001 = vrot.lane.b32.xlu0 %v1000_v29, %s2423_s15 }
0x1882   :  { %v1835_v30 = vpop.permute.xlu0 %1834 }
0x1883   :  { %v1837_v31 = vmul.f32 %v2388_v18, %v1835_v30 }
0x1885   :  { %v1838_v32 = vpack.c.bf16 %v1837_v31, %v1837_v31 }
0x1886   :  { %v1002_v34 = vpop.permute.xlu0 %1001 }
0x1887   :  { %v1840_v3 = vrot.slane %v1838_v32, 4  ;;  %1004 = vst.msk [vmem:[#allocation3 + $0x8] sm:$0xf0] %vm583_vm7, %v1002_v34 }
0x1889   :  { %1841 = vrot.lane.b32.xlu0 %v1840_v3, %s2423_s15  ;;  %s1950_s15 = sshll.u32 %s2424_s10, 4  ;;  %s1951_s15 = int_to_ptr.vmem [resolvable:$true] %s1950_s15 }
0x188a   :  { %s2391_s8 = scalar_lea.vmem %s1951_s15, 1024  ;;  %p2396_p1 = scmp.lt.s32.totalorder %s1951_s15, %s1951_s15 }
0x188b   :  { %p2392_p0 = scmp.ne.s32.totalorder %s1951_s15, %s2391_s8  ;;  %p2397_p2 = scmp.lt.s32.totalorder %s2391_s8, %s2391_s8 }
0x188d   :  { %p2398_p3 = por %p2397_p2, %p2396_p1 }
0x188e   :  { %v1846_v36 = vld [vmem:[#allocation3 + $0x8] sm:$0xff] }
0x188f   :  { %2236 = vmatmul.mubr.msk.bf16.vlgmr.msra.gmra.mrb[48].mxu0 %vm238_vm6, %v1846_v36  ;;  %p2399_p4 = pnand %p2398_p3, %p2392_p0 }
0x1890   :  { %2239 = vmatprep.mubr.msk.bf16.mxu0 %vm238_vm6, %v1847_v37 }
0x18fb   :  { %v1842_v38 = vpop.permute.xlu0 %1841 }
0x18fc   :  { %1844 = vst.msk [vmem:[#allocation3 + $0x18] sm:$0xf0] %vm583_vm7, %v1842_v38 }
0x1903   :  { %v1848_v17 = vld [vmem:[#allocation3 + $0x18] sm:$0xff] }
0x1904   :  { %2240 = vmatmul.mubr.msk.bf16.gmra.mrb[52].mxu0 %vm238_vm6, %v1848_v17 }
0x1962   :  { %v2237_v40 = vpop.f32.mrb[48].mxu0 }
0x1963   :  { %v1915_v41 = vadd.f32 %v2237_v40, %v2016_v39  ;;  %v1906_v42 = vpop.f32.mrb[49].mxu0 }
0x1964   :  { %v1907_v43 = vadd.f32 %v2016_v39, %v1906_v42  ;;  %v2238_v44 = vpop.f32.mrb[50].mxu0 }
0x1965   :  { %1939 = vst [vmem:[#allocation4 + $0x10] sm:$0xff] %v1915_v41  ;;  %v1918_v45 = vadd.f32 %v2238_v44, %v2016_v39  ;;  %v1909_v46 = vpop.f32.mrb[51].mxu0 }
0x1966   :  { %1937 = vst [vmem:[#allocation4] sm:$0xff] %v1907_v43  ;;  %v1910_v47 = vadd.f32 %v2016_v39, %v1909_v46 }
0x1967   :  { %1940 = vst [vmem:[#allocation4 + $0x18] sm:$0xff] %v1918_v45 }
0x1968   :  { %1938 = vst [vmem:[#allocation4 + $0x8] sm:$0xff] %v1910_v47 }
0x19d7   :  { %v2241_v48 = vpop.f32.mrb[52].mxu0 }
0x19d8   :  { %v1931_v49 = vadd.f32 %v2241_v48, %v2016_v39  ;;  %v1922_v50 = vpop.f32.mrb[53].mxu0 }
0x19d9   :  { %v1923_v51 = vadd.f32 %v2016_v39, %v1922_v50  ;;  %v2242_v52 = vpop.f32.mrb[54].mxu0 }
0x19da   :  { %1943 = vst [vmem:[#allocation4 + $0x30] sm:$0xff] %v1931_v49  ;;  %v1934_v53 = vadd.f32 %v2242_v52, %v2016_v39  ;;  %v1925_v54 = vpop.f32.mrb[55].mxu0 }
0x19db   :  { %1941 = vst [vmem:[#allocation4 + $0x20] sm:$0xff] %v1923_v51  ;;  %v1926_v55 = vadd.f32 %v2016_v39, %v1925_v54 }
0x19dc   :  { %1944 = vst [vmem:[#allocation4 + $0x38] sm:$0xff] %v1934_v53 }
0x19dd   :  { %1942 = vst [vmem:[#allocation4 + $0x28] sm:$0xff] %v1926_v55 }
0x19de   :  { %2402 = shalt.err (!%p2399_p4)
}
0x19df   :  { %s2403_s16 = scalar_lea.hbm %s2889_s9, 1024 }
0x19e0   :  { %p2404_p5 = scmp.ne.s32.totalorder %s2889_s9, %s2403_s16  ;;  %p2407_p6 = scmp.lt.u32.totalorder %s2403_s16, %s2889_s9 }
0x19e2   :  { %p2409_p7 = pnand %p2407_p6, %p2404_p5 }
0x19e4   :  { %2412 = shalt.err (!%p2409_p7)
}
0x19e5   :  { %s2425_s20 = smov 128  }
0x19e6   :  { %1956 = dma.vmem_to_hbm [thread:$0]  %s1951_s15, 1024, %s2889_s9, [#allocation5], %s2425_s20, %s2425_s20, %s2422_s11  }
0x19e7   :  { %2413 = dma.done.wait [#allocation5], 1024  }
0x19e8   :  { %2414 = vsyncadd [#allocation5], 4294966272 }
0x19e9   :  { %1960 = vsyncpa [#allocation5], 1 }

</bundles_post_ra>
